<compile_context>
chip_gen: v7x
topology: tpu7x:2x2x1
jax: 0.10.0
libtpu: 0.0.40
codegen_flags: <defaults>
</compile_context>

<pallas_src>
import functools
import math

import jax
import jax.numpy as jnp
from jax.experimental import pallas as pl
from jax.experimental.pallas import tpu as pltpu


def _layernorm(x, w, b, eps=1e-5):
    # x: (M, D) f32; w, b: (1, D) f32
    mu = jnp.mean(x, axis=-1, keepdims=True)
    var = jnp.mean(jnp.square(x - mu), axis=-1, keepdims=True)
    return (x - mu) * jax.lax.rsqrt(var + eps) * w + b


def decoder_layer_kernel(
    x_ref,      # (S, Bt, D)  f32   (PyTorch seq-major layout)
    wqkv_ref,   # (D, 3D)     bf16  == in_proj_weight.T, Q columns pre-scaled
    bqkv_ref,   # (1, 3D)     f32   (Q third pre-scaled)
    wo_ref,     # (D, D)      bf16  == out_proj.weight.T
    bo_ref,     # (1, D)      f32
    ln1w_ref,   # (1, D)      f32
    ln1b_ref,   # (1, D)      f32
    w1_ref,     # (D, F)      bf16  == linear1.weight.T
    b1_ref,     # (1, F)      f32
    w2_ref,     # (F, D)      bf16  == linear2.weight.T
    b2_ref,     # (1, D)      f32
    ln2w_ref,   # (1, D)      f32
    ln2b_ref,   # (1, D)      f32
    o_ref,      # (S, Bt, D)  f32
    *,
    n_heads: int,
):
    S, Bt, D = x_ref.shape
    H = n_heads
    hd = D // H
    M = S * Bt

    # Single layout change on entry: merge (S, Bt) rows into one big matmul M.
    # Row order (seq-major) is irrelevant for all row-wise ops below.
    xm = x_ref[...].reshape(M, D)                               # (M, D) f32

    # --- fused QKV projection (bf16 operands, f32 accumulation) -------------
    qkv = jnp.dot(xm.astype(jnp.bfloat16), wqkv_ref[...],
                  preferred_element_type=jnp.float32) + bqkv_ref[...]
    qkv16 = qkv.astype(jnp.bfloat16)            # cast once; Q already scaled
    q = qkv16[:, 0 * D:1 * D]
    k = qkv16[:, 1 * D:2 * D]
    v = qkv16[:, 2 * D:3 * D]

    # --- self attention: heads batched into one dot_general pair ------------
    def to_heads(t):                            # (M, D) -> (Bt*H, S, hd)
        t = t.reshape(S, Bt, H, hd)
        t = jnp.transpose(t, (1, 2, 0, 3))      # (Bt, H, S, hd)
        return t.reshape(Bt * H, S, hd)

    qh, kh, vh = to_heads(q), to_heads(k), to_heads(v)

    s = jnp.einsum("bqd,bkd->bqk", qh, kh,
                   preferred_element_type=jnp.float32)          # (BH, S, S) f32
    m = jnp.max(s, axis=-1, keepdims=True)
    p = jnp.exp(s - m)
    p = p * pl.reciprocal(jnp.sum(p, axis=-1, keepdims=True), approx=True)
    av = jnp.einsum("bqk,bkd->bqd", p.astype(jnp.bfloat16), vh,
                    preferred_element_type=jnp.float32)         # (BH, S, hd)

    attn = av.reshape(Bt, H, S, hd)
    attn = jnp.transpose(attn, (2, 0, 1, 3)).reshape(M, D)      # back to (M, D)
    attn = jnp.dot(attn.astype(jnp.bfloat16), wo_ref[...],
                   preferred_element_type=jnp.float32) + bo_ref[...]

    # residual + norm1  (dropout1 = identity)
    h1 = _layernorm(xm + attn, ln1w_ref[...], ln1b_ref[...])

    # --- feed-forward  (dropout2 = identity) --------------------------------
    ff = jnp.dot(h1.astype(jnp.bfloat16), w1_ref[...],
                 preferred_element_type=jnp.float32) + b1_ref[...]
    ff = jnp.maximum(ff, 0.0).astype(jnp.bfloat16)   # drop the f32 (M,F) temp
    ff = jnp.dot(ff, w2_ref[...],
                 preferred_element_type=jnp.float32) + b2_ref[...]

    # residual + norm2  (dropout3 = identity)
    out = _layernorm(h1 + ff, ln2w_ref[...], ln2b_ref[...])     # (M, D) f32

    # Single full-block, lane-dense store on exit.
    o_ref[...] = out.reshape(S, Bt, D).astype(o_ref.dtype)


def _act_vmem_bytes(bt, S, D, F, H):
    """Rough per-grid-step activation VMEM footprint (bytes)."""
    M = bt * S
    tiles = 2 * 2 * M * D * 4                     # in/out blocks, double-buffered
    qkv = M * 3 * D * (4 + 2)                     # f32 result + bf16 copy
    heads = 3 * M * D * 2                         # packed q/k/v bf16
    scores = bt * H * S * S * (4 + 2)             # f32 scores + bf16 probs
    ffn = M * F * (4 + 2)                         # f32 pre-act + bf16 post-act
    misc = 5 * M * D * 4                          # attn / h1 / ff / out temps
    return tiles + qkv + heads + scores + ffn + misc


def _pick_batch_tile(B, S, D, F, H, act_budget):
    """Batch tile Bt: divides B, keeps the block's second-minor dim legal
    (== B or a multiple of 8), fits the VMEM budget, targets >=512 matmul rows
    per step, and prefers >=2 grid steps so both v7x TensorCores get work."""
    legal = [bt for bt in range(1, B + 1)
             if B % bt == 0 and (bt == B or bt % 8 == 0)]
    fits = [bt for bt in legal
            if _act_vmem_bytes(bt, S, D, F, H) <= act_budget] or [legal[0]]
    multi = [bt for bt in fits if bt < B and bt * S >= 512]
    if multi:
        return max(multi)
    return max(fits)


def decoder_layer(x_sbd, params, n_heads):
    """x_sbd: (S, B, D) exactly like the PyTorch module (batch_first=False).
    Returns (S, B, D) float32."""
    S, B, D = x_sbd.shape
    assert D % n_heads == 0, "embed dim must be divisible by n_heads"
    F = params["w1"].shape[1]
    hd = D // n_heads
    scale = 1.0 / math.sqrt(hd)

    # Fold the attention scale into the Q third of the in-projection (free at
    # run time), then cast the big matmul weights to bf16 for the MXU.
    col_scale = jnp.concatenate(
        [jnp.full((D,), scale, jnp.float32), jnp.ones((2 * D,), jnp.float32)])
    wqkv = (params["wqkv"] * col_scale).astype(jnp.bfloat16)
    bqkv = (params["bqkv"] * col_scale).astype(jnp.float32)
    wo = params["wo"].astype(jnp.bfloat16)
    w1 = params["w1"].astype(jnp.bfloat16)
    w2 = params["w2"].astype(jnp.bfloat16)

    weight_args = (wqkv, bqkv, wo, params["bo"],
                   params["ln1_w"], params["ln1_b"],
                   w1, params["b1"], w2, params["b2"],
                   params["ln2_w"], params["ln2_b"])

    nbytes = lambda a: int(a.size) * jnp.dtype(a.dtype).itemsize
    weight_bytes = sum(nbytes(w) for w in weight_args)

    # Hardware-aware VMEM budget (v7x: 64 MiB/TC; v5e/v6e: 128 MiB).
    try:
        vmem_cap = int(pltpu.get_tpu_info().vmem_capacity_bytes)
    except Exception:
        vmem_cap = 64 * 2**20
    headroom = 8 * 2**20
    act_budget = max(4 * 2**20, vmem_cap - headroom - weight_bytes)

    bt = _pick_batch_tile(B, S, D, F, n_heads, act_budget)
    grid = (B // bt,)

    vmem_limit = int(max(16 * 2**20,
                         min(vmem_cap - headroom,
                             weight_bytes + _act_vmem_bytes(bt, S, D, F, n_heads)
                             + 4 * 2**20)))

    def _weight_spec(shape):
        index_map = lambda g: (0,) * len(shape)
        try:
            # Grid-constant operand: single-buffer to halve weight residency.
            return pl.BlockSpec(shape, index_map, pipeline_mode=pl.Buffered(1))
        except (TypeError, ValueError):
            return pl.BlockSpec(shape, index_map)

    in_specs = [pl.BlockSpec((S, bt, D), lambda g: (0, g, 0))]      # x
    in_specs += [_weight_spec(w.shape) for w in weight_args]

    out = pl.pallas_call(
        functools.partial(decoder_layer_kernel, n_heads=n_heads),
        out_shape=jax.ShapeDtypeStruct((S, B, D), jnp.float32),
        grid_spec=pltpu.PrefetchScalarGridSpec(
            num_scalar_prefetch=0,
            grid=grid,
            in_specs=in_specs,
            out_specs=pl.BlockSpec((S, bt, D), lambda g: (0, g, 0)),
        ),
        compiler_params=pltpu.CompilerParams(
            dimension_semantics=("parallel",),
            vmem_limit_bytes=vmem_limit),
    )(x_sbd, *weight_args)
    return out


def reference_decoder_layer(x_sbd, params, n_heads):
    """Pure-JAX f32 reference with eval-mode PyTorch semantics."""
    S, B, D = x_sbd.shape
    hd = D // n_heads
    scale = 1.0 / math.sqrt(hd)
    x = jnp.transpose(x_sbd, (1, 0, 2))                         # (B, S, D)
    qkv = x @ params["wqkv"] + params["bqkv"][0]
    q, k, v = jnp.split(qkv, 3, axis=-1)

    def heads(t):
        return t.reshape(B, S, n_heads, hd).transpose(0, 2, 1, 3)

    qh, kh, vh = heads(q) * scale, heads(k), heads(v)
    p = jax.nn.softmax(jnp.einsum("bhqd,bhkd->bhqk", qh, kh), axis=-1)
    a = jnp.einsum("bhqk,bhkd->bhqd", p, vh).transpose(0, 2, 1, 3).reshape(B, S, D)
    attn = a @ params["wo"] + params["bo"][0]

    def ln(t, w, b):
        mu = t.mean(-1, keepdims=True)
        var = ((t - mu) ** 2).mean(-1, keepdims=True)
        return (t - mu) * jax.lax.rsqrt(var + 1e-5) * w[0] + b[0]

    h1 = ln(x + attn, params["ln1_w"], params["ln1_b"])
    ff = jnp.maximum(h1 @ params["w1"] + params["b1"][0], 0.0) @ params["w2"] + params["b2"][0]
    h2 = ln(h1 + ff, params["ln2_w"], params["ln2_b"])
    return jnp.transpose(h2, (1, 0, 2))


def init_params(key, dim, ff_dim):
    ks = jax.random.split(key, 8)
    s = 0.05
    return {
        "wqkv": s * jax.random.normal(ks[0], (dim, 3 * dim), jnp.float32),
        "bqkv": s * jax.random.normal(ks[1], (1, 3 * dim), jnp.float32),
        "wo":   s * jax.random.normal(ks[2], (dim, dim), jnp.float32),
        "bo":   s * jax.random.normal(ks[3], (1, dim), jnp.float32),
        "ln1_w": jnp.ones((1, dim), jnp.float32),
        "ln1_b": jnp.zeros((1, dim), jnp.float32),
        "w1":   s * jax.random.normal(ks[4], (dim, ff_dim), jnp.float32),
        "b1":   s * jax.random.normal(ks[5], (1, ff_dim), jnp.float32),
        "w2":   s * jax.random.normal(ks[6], (ff_dim, dim), jnp.float32),
        "b2":   s * jax.random.normal(ks[7], (1, dim), jnp.float32),
        "ln2_w": jnp.ones((1, dim), jnp.float32),
        "ln2_b": jnp.zeros((1, dim), jnp.float32),
    }


if __name__ == "__main__":
    # Small shapes consistent with the module: dim=32, n_heads=4, ff=64, seq=8, batch=2
    SEQ, BATCH, DIM, FF, HEADS = 8, 2, 32, 64, 4

    key = jax.random.PRNGKey(0)
    kx, kp = jax.random.split(key)
    x = jax.random.normal(kx, (SEQ, BATCH, DIM), jnp.float32)   # (S, B, D) PyTorch MHA layout
    params = init_params(kp, DIM, FF)

    out = decoder_layer(x, params, HEADS)
    out = jax.block_until_ready(out)

    ref = reference_decoder_layer(x, params, HEADS)
    assert out.shape == (SEQ, BATCH, DIM)
    max_err = float(jnp.max(jnp.abs(out - ref)))
    # bf16 matmul operands + approx reciprocal vs. the pure-f32 reference.
    assert jnp.allclose(out, ref, atol=5e-2, rtol=5e-2), \
        f"mismatch vs JAX reference (max abs err {max_err})"
    print("KERNEL_OK")
</pallas_src>

<mosaic_0001>
module attributes {stable_mosaic.version = 11 : i64} {
  func.func @decoder_layer_kernel(%arg0: i32, %arg1: memref<8x2x32xf32, #tpu.memory_space<vmem>>, %arg2: memref<32x96xbf16, #tpu.memory_space<vmem>>, %arg3: memref<1x96xf32, #tpu.memory_space<vmem>>, %arg4: memref<32x32xbf16, #tpu.memory_space<vmem>>, %arg5: memref<1x32xf32, #tpu.memory_space<vmem>>, %arg6: memref<1x32xf32, #tpu.memory_space<vmem>>, %arg7: memref<1x32xf32, #tpu.memory_space<vmem>>, %arg8: memref<32x64xbf16, #tpu.memory_space<vmem>>, %arg9: memref<1x64xf32, #tpu.memory_space<vmem>>, %arg10: memref<64x32xbf16, #tpu.memory_space<vmem>>, %arg11: memref<1x32xf32, #tpu.memory_space<vmem>>, %arg12: memref<1x32xf32, #tpu.memory_space<vmem>>, %arg13: memref<1x32xf32, #tpu.memory_space<vmem>>, %arg14: memref<8x2x32xf32, #tpu.memory_space<vmem>>) attributes {dimension_semantics = [#tpu.dimension_semantics<parallel>], iteration_bounds = array<i64: 1>, scalar_prefetch = 0 : i64, scratch_operands = 0 : i64, tpu.core_type = #tpu.core_type<tc>, window_params = [{transform_indices = @transform_0, window_bounds = array<i64: 8, 2, 32>}, {pipeline_mode = #tpu.pipeline_mode<synchronous>, transform_indices = @transform_1, window_bounds = array<i64: 32, 96>}, {pipeline_mode = #tpu.pipeline_mode<synchronous>, transform_indices = @transform_2, window_bounds = array<i64: 1, 96>}, {pipeline_mode = #tpu.pipeline_mode<synchronous>, transform_indices = @transform_3, window_bounds = array<i64: 32, 32>}, {pipeline_mode = #tpu.pipeline_mode<synchronous>, transform_indices = @transform_4, window_bounds = array<i64: 1, 32>}, {pipeline_mode = #tpu.pipeline_mode<synchronous>, transform_indices = @transform_5, window_bounds = array<i64: 1, 32>}, {pipeline_mode = #tpu.pipeline_mode<synchronous>, transform_indices = @transform_6, window_bounds = array<i64: 1, 32>}, {pipeline_mode = #tpu.pipeline_mode<synchronous>, transform_indices = @transform_7, window_bounds = array<i64: 32, 64>}, {pipeline_mode = #tpu.pipeline_mode<synchronous>, transform_indices = @transform_8, window_bounds = array<i64: 1, 64>}, {pipeline_mode = #tpu.pipeline_mode<synchronous>, transform_indices = @transform_9, window_bounds = array<i64: 64, 32>}, {pipeline_mode = #tpu.pipeline_mode<synchronous>, transform_indices = @transform_10, window_bounds = array<i64: 1, 32>}, {pipeline_mode = #tpu.pipeline_mode<synchronous>, transform_indices = @transform_11, window_bounds = array<i64: 1, 32>}, {pipeline_mode = #tpu.pipeline_mode<synchronous>, transform_indices = @transform_12, window_bounds = array<i64: 1, 32>}, {transform_indices = @transform_13, window_bounds = array<i64: 8, 2, 32>}]} {
    %c0 = arith.constant 0 : index
    %c0_0 = arith.constant 0 : index
    %c0_1 = arith.constant 0 : index
    %0 = vector.load %arg1[%c0, %c0_0, %c0_1] : memref<8x2x32xf32, #tpu.memory_space<vmem>>, vector<8x2x32xf32>
    %1 = vector.shape_cast %0 : vector<8x2x32xf32> to vector<16x32xf32>
    %2 = arith.truncf %1 : vector<16x32xf32> to vector<16x32xbf16>
    %c0_2 = arith.constant 0 : index
    %c0_3 = arith.constant 0 : index
    %3 = vector.load %arg2[%c0_2, %c0_3] : memref<32x96xbf16, #tpu.memory_space<vmem>>, vector<32x96xbf16>
    %cst = arith.constant dense<0.000000e+00> : vector<16x96xf32>
    %4 = tpu.matmul %2, %3, %cst {dimension_numbers = #tpu.dot_dimension_numbers<[1], [0], [0], [1], [0, 0, 1, 1], [], []>} : vector<16x32xbf16>, vector<32x96xbf16>, vector<16x96xf32> -> vector<16x96xf32>
    %c0_4 = arith.constant 0 : index
    %c0_5 = arith.constant 0 : index
    %5 = vector.load %arg3[%c0_4, %c0_5] : memref<1x96xf32, #tpu.memory_space<vmem>>, vector<1x96xf32>
    %6 = vector.broadcast %5 : vector<1x96xf32> to vector<16x96xf32>
    %7 = arith.addf %4, %6 : vector<16x96xf32>
    %8 = arith.truncf %7 : vector<16x96xf32> to vector<16x96xbf16>
    %9 = vector.extract_strided_slice %8 {offsets = [0, 0], sizes = [16, 32], strides = [1, 1]} : vector<16x96xbf16> to vector<16x32xbf16>
    %10 = vector.extract_strided_slice %8 {offsets = [0, 32], sizes = [16, 32], strides = [1, 1]} : vector<16x96xbf16> to vector<16x32xbf16>
    %11 = vector.extract_strided_slice %8 {offsets = [0, 64], sizes = [16, 32], strides = [1, 1]} : vector<16x96xbf16> to vector<16x32xbf16>
    %12 = vector.shape_cast %9 : vector<16x32xbf16> to vector<8x2x4x8xbf16>
    %13 = tpu.transpose %12, [1, 2, 0, 3] : vector<8x2x4x8xbf16> -> vector<2x4x8x8xbf16>
    %14 = vector.shape_cast %13 : vector<2x4x8x8xbf16> to vector<8x8x8xbf16>
    %15 = vector.shape_cast %10 : vector<16x32xbf16> to vector<8x2x4x8xbf16>
    %16 = tpu.transpose %15, [1, 2, 0, 3] : vector<8x2x4x8xbf16> -> vector<2x4x8x8xbf16>
    %17 = vector.shape_cast %16 : vector<2x4x8x8xbf16> to vector<8x8x8xbf16>
    %18 = vector.shape_cast %11 : vector<16x32xbf16> to vector<8x2x4x8xbf16>
    %19 = tpu.transpose %18, [1, 2, 0, 3] : vector<8x2x4x8xbf16> -> vector<2x4x8x8xbf16>
    %20 = vector.shape_cast %19 : vector<2x4x8x8xbf16> to vector<8x8x8xbf16>
    "tpu.trace_start"() <{level = 10 : i32, message = "bqd,bkd->bqk"}> : () -> ()
    %cst_6 = arith.constant dense<0.000000e+00> : vector<8x8x8xf32>
    %21 = tpu.matmul %14, %17, %cst_6 {dimension_numbers = #tpu.dot_dimension_numbers<[2], [2], [1], [1], [0, 0, 0, 1, 1, 1], [0], [0]>} : vector<8x8x8xbf16>, vector<8x8x8xbf16>, vector<8x8x8xf32> -> vector<8x8x8xf32>
    "tpu.trace_stop"() : () -> ()
    %cst_7 = arith.constant dense<0xFF800000> : vector<8x8xf32>
    %22 = vector.multi_reduction <maximumf>, %21, %cst_7 [2] : vector<8x8x8xf32> to vector<8x8xf32>
    %23 = vector.shape_cast %22 : vector<8x8xf32> to vector<8x8x1xf32>
    %24 = vector.broadcast %23 : vector<8x8x1xf32> to vector<8x8x8xf32>
    %25 = arith.subf %21, %24 : vector<8x8x8xf32>
    %26 = math.exp %25 : vector<8x8x8xf32>
    %cst_8 = arith.constant dense<0.000000e+00> : vector<8x8xf32>
    %27 = vector.multi_reduction <add>, %26, %cst_8 [2] : vector<8x8x8xf32> to vector<8x8xf32>
    %28 = vector.shape_cast %27 : vector<8x8xf32> to vector<8x8x1xf32>
    %29 = tpu.reciprocal %28 {approx = true} : vector<8x8x1xf32> -> vector<8x8x1xf32>
    %30 = vector.broadcast %29 : vector<8x8x1xf32> to vector<8x8x8xf32>
    %31 = arith.mulf %26, %30 : vector<8x8x8xf32>
    %32 = arith.truncf %31 : vector<8x8x8xf32> to vector<8x8x8xbf16>
    "tpu.trace_start"() <{level = 10 : i32, message = "bqk,bkd->bqd"}> : () -> ()
    %cst_9 = arith.constant dense<0.000000e+00> : vector<8x8x8xf32>
    %33 = tpu.matmul %32, %20, %cst_9 {dimension_numbers = #tpu.dot_dimension_numbers<[2], [1], [1], [2], [0, 0, 0, 1, 1, 2], [0], [0]>} : vector<8x8x8xbf16>, vector<8x8x8xbf16>, vector<8x8x8xf32> -> vector<8x8x8xf32>
    "tpu.trace_stop"() : () -> ()
    %34 = vector.shape_cast %33 : vector<8x8x8xf32> to vector<2x4x8x8xf32>
    %35 = tpu.transpose %34, [2, 0, 1, 3] : vector<2x4x8x8xf32> -> vector<8x2x4x8xf32>
    %36 = vector.shape_cast %35 : vector<8x2x4x8xf32> to vector<16x32xf32>
    %37 = arith.truncf %36 : vector<16x32xf32> to vector<16x32xbf16>
    %c0_10 = arith.constant 0 : index
    %c0_11 = arith.constant 0 : index
    %38 = vector.load %arg4[%c0_10, %c0_11] : memref<32x32xbf16, #tpu.memory_space<vmem>>, vector<32x32xbf16>
    %cst_12 = arith.constant dense<0.000000e+00> : vector<16x32xf32>
    %39 = tpu.matmul %37, %38, %cst_12 {dimension_numbers = #tpu.dot_dimension_numbers<[1], [0], [0], [1], [0, 0, 1, 1], [], []>} : vector<16x32xbf16>, vector<32x32xbf16>, vector<16x32xf32> -> vector<16x32xf32>
    %c0_13 = arith.constant 0 : index
    %c0_14 = arith.constant 0 : index
    %40 = vector.load %arg5[%c0_13, %c0_14] : memref<1x32xf32, #tpu.memory_space<vmem>>, vector<1x32xf32>
    %41 = vector.broadcast %40 : vector<1x32xf32> to vector<16x32xf32>
    %42 = arith.addf %39, %41 : vector<16x32xf32>
    %43 = arith.addf %1, %42 : vector<16x32xf32>
    %c0_15 = arith.constant 0 : index
    %c0_16 = arith.constant 0 : index
    %44 = vector.load %arg6[%c0_15, %c0_16] : memref<1x32xf32, #tpu.memory_space<vmem>>, vector<1x32xf32>
    %c0_17 = arith.constant 0 : index
    %c0_18 = arith.constant 0 : index
    %45 = vector.load %arg7[%c0_17, %c0_18] : memref<1x32xf32, #tpu.memory_space<vmem>>, vector<1x32xf32>
    %cst_19 = arith.constant dense<0.000000e+00> : vector<16xf32>
    %46 = vector.multi_reduction <add>, %43, %cst_19 [1] : vector<16x32xf32> to vector<16xf32>
    %47 = vector.shape_cast %46 : vector<16xf32> to vector<16x1xf32>
    %cst_20 = arith.constant 3.200000e+01 : f32
    %48 = vector.broadcast %cst_20 : f32 to vector<16x1xf32>
    %49 = arith.divf %47, %48 : vector<16x1xf32>
    %50 = vector.broadcast %49 : vector<16x1xf32> to vector<16x32xf32>
    %51 = arith.subf %43, %50 : vector<16x32xf32>
    %52 = arith.mulf %51, %51 : vector<16x32xf32>
    %cst_21 = arith.constant dense<0.000000e+00> : vector<16xf32>
    %53 = vector.multi_reduction <add>, %52, %cst_21 [1] : vector<16x32xf32> to vector<16xf32>
    %54 = vector.shape_cast %53 : vector<16xf32> to vector<16x1xf32>
    %cst_22 = arith.constant 3.200000e+01 : f32
    %55 = vector.broadcast %cst_22 : f32 to vector<16x1xf32>
    %56 = arith.divf %54, %55 : vector<16x1xf32>
    %57 = vector.broadcast %49 : vector<16x1xf32> to vector<16x32xf32>
    %58 = arith.subf %43, %57 : vector<16x32xf32>
    %cst_23 = arith.constant 9.99999974E-6 : f32
    %59 = vector.broadcast %cst_23 : f32 to vector<16x1xf32>
    %60 = arith.addf %56, %59 : vector<16x1xf32>
    %61 = math.rsqrt %60 : vector<16x1xf32>
    %62 = vector.broadcast %61 : vector<16x1xf32> to vector<16x32xf32>
    %63 = arith.mulf %58, %62 : vector<16x32xf32>
    %64 = vector.broadcast %44 : vector<1x32xf32> to vector<16x32xf32>
    %65 = arith.mulf %63, %64 : vector<16x32xf32>
    %66 = vector.broadcast %45 : vector<1x32xf32> to vector<16x32xf32>
    %67 = arith.addf %65, %66 : vector<16x32xf32>
    %68 = arith.truncf %67 : vector<16x32xf32> to vector<16x32xbf16>
    %c0_24 = arith.constant 0 : index
    %c0_25 = arith.constant 0 : index
    %69 = vector.load %arg8[%c0_24, %c0_25] : memref<32x64xbf16, #tpu.memory_space<vmem>>, vector<32x64xbf16>
    %cst_26 = arith.constant dense<0.000000e+00> : vector<16x64xf32>
    %70 = tpu.matmul %68, %69, %cst_26 {dimension_numbers = #tpu.dot_dimension_numbers<[1], [0], [0], [1], [0, 0, 1, 1], [], []>} : vector<16x32xbf16>, vector<32x64xbf16>, vector<16x64xf32> -> vector<16x64xf32>
    %c0_27 = arith.constant 0 : index
    %c0_28 = arith.constant 0 : index
    %71 = vector.load %arg9[%c0_27, %c0_28] : memref<1x64xf32, #tpu.memory_space<vmem>>, vector<1x64xf32>
    %72 = vector.broadcast %71 : vector<1x64xf32> to vector<16x64xf32>
    %73 = arith.addf %70, %72 : vector<16x64xf32>
    %cst_29 = arith.constant 0.000000e+00 : f32
    %74 = vector.broadcast %cst_29 : f32 to vector<16x64xf32>
    %75 = arith.maximumf %73, %74 : vector<16x64xf32>
    %76 = arith.truncf %75 : vector<16x64xf32> to vector<16x64xbf16>
    %c0_30 = arith.constant 0 : index
    %c0_31 = arith.constant 0 : index
    %77 = vector.load %arg10[%c0_30, %c0_31] : memref<64x32xbf16, #tpu.memory_space<vmem>>, vector<64x32xbf16>
    %cst_32 = arith.constant dense<0.000000e+00> : vector<16x32xf32>
    %78 = tpu.matmul %76, %77, %cst_32 {dimension_numbers = #tpu.dot_dimension_numbers<[1], [0], [0], [1], [0, 0, 1, 1], [], []>} : vector<16x64xbf16>, vector<64x32xbf16>, vector<16x32xf32> -> vector<16x32xf32>
    %c0_33 = arith.constant 0 : index
    %c0_34 = arith.constant 0 : index
    %79 = vector.load %arg11[%c0_33, %c0_34] : memref<1x32xf32, #tpu.memory_space<vmem>>, vector<1x32xf32>
    %80 = vector.broadcast %79 : vector<1x32xf32> to vector<16x32xf32>
    %81 = arith.addf %78, %80 : vector<16x32xf32>
    %82 = arith.addf %67, %81 : vector<16x32xf32>
    %c0_35 = arith.constant 0 : index
    %c0_36 = arith.constant 0 : index
    %83 = vector.load %arg12[%c0_35, %c0_36] : memref<1x32xf32, #tpu.memory_space<vmem>>, vector<1x32xf32>
    %c0_37 = arith.constant 0 : index
    %c0_38 = arith.constant 0 : index
    %84 = vector.load %arg13[%c0_37, %c0_38] : memref<1x32xf32, #tpu.memory_space<vmem>>, vector<1x32xf32>
    %cst_39 = arith.constant dense<0.000000e+00> : vector<16xf32>
    %85 = vector.multi_reduction <add>, %82, %cst_39 [1] : vector<16x32xf32> to vector<16xf32>
    %86 = vector.shape_cast %85 : vector<16xf32> to vector<16x1xf32>
    %cst_40 = arith.constant 3.200000e+01 : f32
    %87 = vector.broadcast %cst_40 : f32 to vector<16x1xf32>
    %88 = arith.divf %86, %87 : vector<16x1xf32>
    %89 = vector.broadcast %88 : vector<16x1xf32> to vector<16x32xf32>
    %90 = arith.subf %82, %89 : vector<16x32xf32>
    %91 = arith.mulf %90, %90 : vector<16x32xf32>
    %cst_41 = arith.constant dense<0.000000e+00> : vector<16xf32>
    %92 = vector.multi_reduction <add>, %91, %cst_41 [1] : vector<16x32xf32> to vector<16xf32>
    %93 = vector.shape_cast %92 : vector<16xf32> to vector<16x1xf32>
    %cst_42 = arith.constant 3.200000e+01 : f32
    %94 = vector.broadcast %cst_42 : f32 to vector<16x1xf32>
    %95 = arith.divf %93, %94 : vector<16x1xf32>
    %96 = vector.broadcast %88 : vector<16x1xf32> to vector<16x32xf32>
    %97 = arith.subf %82, %96 : vector<16x32xf32>
    %cst_43 = arith.constant 9.99999974E-6 : f32
    %98 = vector.broadcast %cst_43 : f32 to vector<16x1xf32>
    %99 = arith.addf %95, %98 : vector<16x1xf32>
    %100 = math.rsqrt %99 : vector<16x1xf32>
    %101 = vector.broadcast %100 : vector<16x1xf32> to vector<16x32xf32>
    %102 = arith.mulf %97, %101 : vector<16x32xf32>
    %103 = vector.broadcast %83 : vector<1x32xf32> to vector<16x32xf32>
    %104 = arith.mulf %102, %103 : vector<16x32xf32>
    %105 = vector.broadcast %84 : vector<1x32xf32> to vector<16x32xf32>
    %106 = arith.addf %104, %105 : vector<16x32xf32>
    %107 = vector.shape_cast %106 : vector<16x32xf32> to vector<8x2x32xf32>
    %c0_44 = arith.constant 0 : index
    %c0_45 = arith.constant 0 : index
    %c0_46 = arith.constant 0 : index
    %108 = vector.load %arg14[%c0_44, %c0_45, %c0_46] : memref<8x2x32xf32, #tpu.memory_space<vmem>>, vector<8x2x32xf32>
    tpu.vector_store %arg14[%c0_44, %c0_45, %c0_46], %107 {strides = array<i32>} : memref<8x2x32xf32, #tpu.memory_space<vmem>>, vector<8x2x32xf32>,
    return
  }
  func.func @transform_0(%arg0: i32) -> (i32, i32, i32) {
    %c0_i32 = arith.constant 0 : i32
    %c0_i32_0 = arith.constant 0 : i32
    %c0_i32_1 = arith.constant 0 : i32
    return %c0_i32, %arg0, %c0_i32_0 : i32, i32, i32
  }
  func.func @transform_1(%arg0: i32) -> (i32, i32) {
    %c0_i32 = arith.constant 0 : i32
    %c0_i32_0 = arith.constant 0 : i32
    %c0_i32_1 = arith.constant 0 : i32
    return %c0_i32, %c0_i32_0 : i32, i32
  }
  func.func @transform_2(%arg0: i32) -> (i32, i32) {
    %c0_i32 = arith.constant 0 : i32
    %c0_i32_0 = arith.constant 0 : i32
    %c0_i32_1 = arith.constant 0 : i32
    return %c0_i32, %c0_i32_0 : i32, i32
  }
  func.func @transform_3(%arg0: i32) -> (i32, i32) {
    %c0_i32 = arith.constant 0 : i32
    %c0_i32_0 = arith.constant 0 : i32
    %c0_i32_1 = arith.constant 0 : i32
    return %c0_i32, %c0_i32_0 : i32, i32
  }
  func.func @transform_4(%arg0: i32) -> (i32, i32) {
    %c0_i32 = arith.constant 0 : i32
    %c0_i32_0 = arith.constant 0 : i32
    %c0_i32_1 = arith.constant 0 : i32
    return %c0_i32, %c0_i32_0 : i32, i32
  }
  func.func @transform_5(%arg0: i32) -> (i32, i32) {
    %c0_i32 = arith.constant 0 : i32
    %c0_i32_0 = arith.constant 0 : i32
    %c0_i32_1 = arith.constant 0 : i32
    return %c0_i32, %c0_i32_0 : i32, i32
  }
  func.func @transform_6(%arg0: i32) -> (i32, i32) {
    %c0_i32 = arith.constant 0 : i32
    %c0_i32_0 = arith.constant 0 : i32
    %c0_i32_1 = arith.constant 0 : i32
    return %c0_i32, %c0_i32_0 : i32, i32
  }
  func.func @transform_7(%arg0: i32) -> (i32, i32) {
    %c0_i32 = arith.constant 0 : i32
    %c0_i32_0 = arith.constant 0 : i32
    %c0_i32_1 = arith.constant 0 : i32
    return %c0_i32, %c0_i32_0 : i32, i32
  }
  func.func @transform_8(%arg0: i32) -> (i32, i32) {
    %c0_i32 = arith.constant 0 : i32
    %c0_i32_0 = arith.constant 0 : i32
    %c0_i32_1 = arith.constant 0 : i32
    return %c0_i32, %c0_i32_0 : i32, i32
  }
  func.func @transform_9(%arg0: i32) -> (i32, i32) {
    %c0_i32 = arith.constant 0 : i32
    %c0_i32_0 = arith.constant 0 : i32
    %c0_i32_1 = arith.constant 0 : i32
    return %c0_i32, %c0_i32_0 : i32, i32
  }
  func.func @transform_10(%arg0: i32) -> (i32, i32) {
    %c0_i32 = arith.constant 0 : i32
    %c0_i32_0 = arith.constant 0 : i32
    %c0_i32_1 = arith.constant 0 : i32
    return %c0_i32, %c0_i32_0 : i32, i32
  }
  func.func @transform_11(%arg0: i32) -> (i32, i32) {
    %c0_i32 = arith.constant 0 : i32
    %c0_i32_0 = arith.constant 0 : i32
    %c0_i32_1 = arith.constant 0 : i32
    return %c0_i32, %c0_i32_0 : i32, i32
  }
  func.func @transform_12(%arg0: i32) -> (i32, i32) {
    %c0_i32 = arith.constant 0 : i32
    %c0_i32_0 = arith.constant 0 : i32
    %c0_i32_1 = arith.constant 0 : i32
    return %c0_i32, %c0_i32_0 : i32, i32
  }
  func.func @transform_13(%arg0: i32) -> (i32, i32, i32) {
    %c0_i32 = arith.constant 0 : i32
    %c0_i32_0 = arith.constant 0 : i32
    %c0_i32_1 = arith.constant 0 : i32
    return %c0_i32, %arg0, %c0_i32_0 : i32, i32, i32
  }
}

</mosaic_0001>

<bundles_post_ra>
// kernel: tpu_custom_call.1
= control target key start
LH: loop header
LB: loop body
LE: loop exit
PB: predicated region body
PF: predicated region fallthrough
CT: control target
= control target key end

     0   :  { %18 = vsyncpa [#allocation3], 0  ;;  %s4318_s0 = inlined_call_operand.vmem [shape: f32[8,2,32], index: 0, kind: input, shape index: {}]   ;;  %s4319_s1 = inlined_call_operand.vmem [shape: bf16[32,96], index: 1, kind: input, shape index: {}]   ;;  %s4320_s2 = inlined_call_operand.vmem [shape: f32[1,96], index: 2, kind: input, shape index: {}]   ;;  %s4321_s3 = inlined_call_operand.vmem [shape: bf16[32,32], index: 3, kind: input, shape index: {}]   ;;  %s4322_s4 = inlined_call_operand.vmem [shape: f32[1,32], index: 4, kind: input, shape index: {}]   ;;  %s4323_s5 = inlined_call_operand.vmem [shape: f32[1,32], index: 5, kind: input, shape index: {}]   ;;  %s4324_s6 = inlined_call_operand.vmem [shape: f32[1,32], index: 6, kind: input, shape index: {}]   ;;  %s4325_s7 = inlined_call_operand.hbm [shape: bf16[32,64], index: 7, kind: input, shape index: {}]   ;;  %s4326_s8 = inlined_call_operand.vmem [shape: f32[1,64], index: 8, kind: input, shape index: {}]   ;;  %s4327_s9 = inlined_call_operand.vmem [shape: bf16[64,32], index: 9, kind: input, shape index: {}]   ;;  %s4328_s10 = inlined_call_operand.vmem [shape: f32[1,32], index: 10, kind: input, shape index: {}]   ;;  %s4329_s11 = inlined_call_operand.vmem [shape: f32[1,32], index: 11, kind: input, shape index: {}]   ;;  %s4330_s12 = inlined_call_operand.vmem [shape: f32[1,32], index: 12, kind: input, shape index: {}]   ;;  %s4331_s13 = inlined_call_operand.hbm [shape: f32[8,2,32], index: 13, kind: output, shape index: {}]  }
   0x1   :  { %19 = vsyncpa [#allocation4], 0  ;;  %s3602_s25 = smov [#allocation2]   ;;  %s3554_s29 = scalar_lea.hbm %s4325_s7, 256 }
   0x2   :  { %s39_s26 = sshll.u32 %s3602_s25, 4  ;;  %p3555_p0 = scmp.ne.s32.totalorder %s4325_s7, %s3554_s29  ;;  %s40_s26 = int_to_ptr.vmem [resolvable:$true] %s39_s26 }
   0x3   :  { %p3558_p1 = scmp.lt.u32.totalorder %s3554_s29, %s4325_s7 }
   0x5   :  { %p3560_p2 = pnand %p3558_p1, %p3555_p0 }
   0x7   :  { %3563 = shalt.err (!%p3560_p2)
}
   0x8   :  { %s3564_s17 = scalar_lea.vmem %s40_s26, 256  ;;  %p3569_p4 = scmp.lt.s32.totalorder %s40_s26, %s40_s26 }
   0x9   :  { %p3565_p3 = scmp.ne.s32.totalorder %s40_s26, %s3564_s17  ;;  %p3570_p5 = scmp.lt.s32.totalorder %s3564_s17, %s3564_s17 }
   0xb   :  { %p3571_p6 = por %p3570_p5, %p3569_p4 }
   0xd   :  { %p3572_p7 = pnand %p3571_p6, %p3565_p3 }
   0xf   :  { %3575 = shalt.err (!%p3572_p7)
}
  0x10   :  { %s3603_s18 = smov 64   ;;  %s3604_s19 = smov 4  }
  0x11   :  { %45 = dma.hbm_to_vmem [thread:$0]  %s4325_s7, 256, %s40_s26, [#allocation3], %s3603_s18, %s3603_s18, %s3604_s19  }
  0x12   :  { %3598 = dma.done.wait [#allocation3], 256  }
  0x13   :  { %3599 = vsyncadd [#allocation3], 4294967040  ;;  %v81_v0 = vlaneseq  ;;  %v3605_v1 = vmov 0.0   ;;  %vm3606_vm0 = vmmov 0   ;;  %v3607_v2 = vmov 1983009808  }
  0x14   :  { %3327 = vmatprep.subr.bf16.mxu0 %v3605_v1  ;;  %3331 = vmatprep.mubr.msk.bf16.mxu0 %vm3606_vm0, %v3605_v1  ;;  %v79_v3 = vunpack.c.l.s4 %v3607_v2  ;;  %v3496_v6 = vld [vmem:[%s4319_s1] sm:$0xff]   ;;  %v3497_v7 = vld [vmem:[%s4319_s1 + $0x8] sm:$0xff]   ;;  %vm136_vm1 = vcmask 261120   ;;  %s3608_s25 = smov 104   ;;  %s3609_s26 = smov 120   ;;  %v3612_v40 = vmov 0  }
  0x15   :  { %3335 = vmatprep.subr.bf16.mxu1 %v3605_v1  ;;  %3337 = vmatprep.mubr.msk.bf16.mxu1 %vm3606_vm0, %v3605_v1  ;;  %v3714_v5 = vshrl.u32 %v81_v0, 7  ;;  %v60_v9 = vld [vmem:[%s4318_s0] sm:$0x3]  ;;  %v61_v10 = vld [vmem:[%s4318_s0 + $0x2] sm:$0x3]  ;;  %s3610_s27 = smov 96   ;;  %v3780_v41 = vpack.i.b16 %v3612_v40, %v3612_v40 }
  0x16   :  { %v80_v4 = vunpack.c.0.s8 %v79_v3  ;;  %3328 = vmatpush3.bf16.msra.mxu0 %v3496_v6  ;;  %v62_v11 = vld [vmem:[%s4318_s0 + $0x4] sm:$0x3]  ;;  %v63_v12 = vld [vmem:[%s4318_s0 + $0x6] sm:$0x3]  ;;  %v64_v13 = vld [vmem:[%s4318_s0 + $0x8] sm:$0x3]  ;;  %v76_v15 = vcombine.low %v60_v9, %v61_v10 }
  0x17   :  { %3329 = vmatprep.subr.bf16.mxu0 %v3605_v1  ;;  %v65_v14 = vld [vmem:[%s4318_s0 + $0xa] sm:$0x3]  ;;  %v66_v16 = vld [vmem:[%s4318_s0 + $0xc] sm:$0x3]  ;;  %v67_v17 = vld [vmem:[%s4318_s0 + $0xe] sm:$0x3]  ;;  %v77_v18 = vcombine.low %v62_v11, %v63_v12 }
  0x18   :  { %v3723_v8 = vsub.s32 %v80_v4, %v3714_v5  ;;  %v93_v19 = vcombine.low %v64_v13, %v65_v14  ;;  %v94_v21 = vcombine.low %v66_v16, %v67_v17  ;;  %v3231_v28 = vld [vmem:[%s4320_s2] ss:$0 sm:$0xff]  ;;  %s3611_s28 = smov 112   ;;  %v3613_v44 = vmov 1934713408   ;;  %s3615_s14 = smov 8  }
  0x19   :  { %v244_v45 = vunpack.c.l.s4 %v3613_v44  ;;  %vm1027_vm2 = vcmask 64512   ;;  %vm1495_vm3 = vcmask 1043456   ;;  %s3616_s1 = smov 24   ;;  %vm2159_vm4 = vcmask 130048  }
  0x1a   :  { %v84_v20 = vrot.slane %v76_v15, %v3723_v8  ;;  %3330 = vmatpush3.bf16.msra.mxu0 %v3497_v7  ;;  %v91_v22 = vrot.slane %v77_v18, %v3723_v8  ;;  %v101_v23 = vrot.slane %v93_v19, %v3723_v8  ;;  %v108_v24 = vrot.slane %v94_v21, %v3723_v8 }
  0x1b   :  { %3341 = vmatprep.subr.bf16.mxu0 %v3605_v1  ;;  %v245_v49 = vunpack.c.0.s8 %v244_v45  ;;  %vm2162_vm5 = vcmask 195584   ;;  %vm2774_vm6 = vcmask 523264   ;;  %vm3205_vm7 = vcmask 254976  }
  0x1c   :  { %v92_v25 = vcombine.low %v84_v20, %v91_v22  ;;  %v109_v26 = vcombine.low %v101_v23, %v108_v24 }
  0x1d   :  { %v3795_v60 = vsub.s32 %v245_v49, %v3714_v5 }
  0x1e   :  { %v112_v27 = vpack.c.bf16 %v109_v26, %v92_v25 }
  0x20   :  { %3332 = vmatmul.mubr.msk.bf16.vlgmr.msra.gmra.mrb[0].mxu0 %vm136_vm1, %v112_v27 }
  0x21   :  { %3343 = vmatprep.mubr.msk.bf16.mxu0 %vm3606_vm0, %v3605_v1 }
  0xf3   :  { %v174_v29 = vpop.f32.mrb[0].mxu0 }
  0xf4   :  { %v3333_v30 = vpop.f32.mrb[1].mxu0  ;;  %v175_v32 = vadd.f32 %v3231_v28, %v174_v29 }
  0xf5   :  { %v177_v31 = vpop.f32.mrb[2].mxu0 }
  0xf6   :  { %v178_v33 = vadd.f32 %v3231_v28, %v177_v31  ;;  %v3334_v34 = vpop.f32.mrb[3].mxu0 }
  0xf8   :  { %v3761_v35 = vpack.c.bf16 %v178_v33, %v175_v32 }
  0xfa   :  { %187 = vrot.lane.b32.xlu1 %v3761_v35, %s3608_s25  ;;  %183 = vrot.lane.b32.xlu0 %v3761_v35, %s3609_s26  ;;  %v193_v52 = vshrl.u32 %v3761_v35, 16 }
  0xfe   :  { %467 = vrot.lane.b32.xlu1 %v3761_v35, %s3610_s27  ;;  %185 = vrot.lane.b32.xlu0 %v3761_v35, %s3611_s28 }
 0x16c   :  { %v3767_v36 = vpop.permute.xlu0 %183  ;;  %v3770_v37 = vpop.permute.xlu1 %187 }
 0x16d   :  { %469 = vrot.lane.b32.xlu0 %v3767_v36, %s3610_s27  ;;  %v191_v42 = vpack.i.b16 %v3767_v36, %v3761_v35  ;;  %v194_v47 = vshrl.u32 %v3767_v36, 16  ;;  %v202_v54 = vshrl.u32 %v3770_v37, 16 }
 0x16f   :  { %v211_v46 = vcombine.high %v191_v42, %v3780_v41  ;;  %v218_v55 = vrot.slane %v191_v42, %v3723_v8  ;;  %v195_v56 = vpack.i.b16 %v194_v47, %v193_v52 }
 0x170   :  { %v3772_v38 = vpop.permute.xlu0 %185  ;;  %v468_v59 = vpop.permute.xlu1 %467 }
 0x171   :  { %473 = vrot.lane.b32.xlu0 %v3770_v37, %s3610_s27  ;;  %471 = vrot.lane.b32.xlu1 %v3772_v38, %s3610_s27  ;;  %v199_v39 = vpack.i.b16 %v3770_v37, %v3772_v38  ;;  %v201_v50 = vshrl.u32 %v3772_v38, 16  ;;  %v225_v53 = vrot.slane %v211_v46, %v3723_v8  ;;  %v277_v4 = vcombine.high %v195_v56, %v3780_v41 }
 0x172   :  { %v479_v6 = vshrl.u32 %v468_v59, 16  ;;  %v3805_v20 = vrot.slane %v195_v56, %v3723_v8 }
 0x173   :  { %v226_v43 = vcombine.high %v199_v39, %v3780_v41  ;;  %v233_v51 = vrot.slane %v199_v39, %v3723_v8  ;;  %v203_v61 = vpack.i.b16 %v202_v54, %v201_v50  ;;  %v3808_v21 = vrot.slane %v277_v4, %v3723_v8 }
 0x175   :  { %v240_v48 = vrot.slane %v226_v43, %v3723_v8  ;;  %v241_v62 = vcombine.low %v218_v55, %v233_v51  ;;  %v242_v0 = vcombine.high %v218_v55, %v233_v51  ;;  %v292_v11 = vcombine.high %v203_v61, %v3780_v41 }
 0x176   :  { %v3814_v28 = vrot.slane %v203_v61, %v3723_v8 }
 0x177   :  { %v257_v57 = vcombine.low %v225_v53, %v240_v48  ;;  %v258_v58 = vcombine.high %v225_v53, %v240_v48  ;;  %v249_v10 = vrot.slane %v241_v62, %v3795_v60  ;;  %v256_v14 = vrot.slane %v242_v0, %v3795_v60 }
 0x178   :  { %v3817_v29 = vrot.slane %v292_v11, %v3723_v8 }
 0x179   :  { %v265_v7 = vrot.slane %v257_v57, %v3795_v60  ;;  %v272_v9 = vrot.slane %v258_v58, %v3795_v60 }
 0x17b   :  { %v343_v22 = vcombine.low %v249_v10, %v265_v7  ;;  %v351_v23 = vcombine.low %v256_v14, %v272_v9  ;;  %v3235_v42 = vcombine.high %v249_v10, %v265_v7  ;;  %v3236_v43 = vcombine.high %v256_v14, %v272_v9 }
 0x17d   :  { %v350_v46 = vrot.slane %v343_v22, %v3723_v8  ;;  %v358_v47 = vrot.slane %v351_v23, %v3723_v8  ;;  %v375_v58 = vrot.slane %v3235_v42, %v3723_v8  ;;  %v307_v22 = vcombine.low %v3805_v20, %v3814_v28 }
 0x17e   :  { %v308_v23 = vcombine.high %v3805_v20, %v3814_v28 }
 0x1df   :  { %v470_v63 = vpop.permute.xlu0 %469 }
 0x1e0   :  { %v477_v2 = vpack.i.b16 %v470_v63, %v468_v59  ;;  %v480_v3 = vshrl.u32 %v470_v63, 16  ;;  %v383_v59 = vrot.slane %v3236_v43, %v3723_v8 }
 0x1e2   :  { %v481_v15 = vpack.i.b16 %v480_v3, %v479_v6  ;;  %v491_v16 = vcombine.high %v477_v2, %v3780_v41  ;;  %v498_v24 = vrot.slane %v477_v2, %v3723_v8 }
 0x1e3   :  { %v472_v12 = vpop.permute.xlu1 %471  ;;  %v474_v13 = vpop.permute.xlu0 %473 }
 0x1e4   :  { %v487_v17 = vshrl.u32 %v472_v12, 16  ;;  %v485_v18 = vpack.i.b16 %v474_v13, %v472_v12  ;;  %v488_v19 = vshrl.u32 %v474_v13, 16  ;;  %v505_v30 = vrot.slane %v491_v16, %v3723_v8 }
 0x1e5   :  { %v557_v31 = vcombine.high %v481_v15, %v3780_v41  ;;  %v564_v44 = vrot.slane %v481_v15, %v3723_v8 }
 0x1e6   :  { %v489_v25 = vpack.i.b16 %v488_v19, %v487_v17  ;;  %v506_v26 = vcombine.high %v485_v18, %v3780_v41  ;;  %v513_v27 = vrot.slane %v485_v18, %v3723_v8 }
 0x1e7   :  { %v571_v50 = vrot.slane %v557_v31, %v3723_v8  ;;  %v384_v31 = vcombine.low %v375_v58, %v383_v59 }
 0x1e8   :  { %v520_v32 = vrot.slane %v506_v26, %v3723_v8  ;;  %v521_v33 = vcombine.low %v498_v24, %v513_v27  ;;  %v522_v34 = vcombine.high %v498_v24, %v513_v27  ;;  %v572_v39 = vcombine.high %v489_v25, %v3780_v41 }
 0x1e9   :  { %v579_v45 = vrot.slane %v489_v25, %v3723_v8  ;;  %v323_v24 = vcombine.low %v3808_v21, %v3817_v29  ;;  %v324_v25 = vcombine.high %v3808_v21, %v3817_v29 }
 0x1ea   :  { %v537_v48 = vcombine.low %v505_v30, %v520_v32  ;;  %v538_v49 = vcombine.high %v505_v30, %v520_v32  ;;  %v586_v51 = vrot.slane %v572_v39, %v3723_v8  ;;  %v529_v54 = vrot.slane %v521_v33, %v3795_v60 }
 0x1eb   :  { %v587_v52 = vcombine.low %v564_v44, %v579_v45  ;;  %v588_v53 = vcombine.high %v564_v44, %v579_v45  ;;  %v536_v55 = vrot.slane %v522_v34, %v3795_v60  ;;  %v359_v30 = vcombine.low %v350_v46, %v358_v47 }
 0x1ec   :  { %v545_v56 = vrot.slane %v537_v48, %v3795_v60  ;;  %v552_v57 = vrot.slane %v538_v49, %v3795_v60  ;;  %v603_v61 = vcombine.low %v571_v50, %v586_v51  ;;  %v604_v62 = vcombine.high %v571_v50, %v586_v51 }
 0x1ed   :  { %v595_v4 = vrot.slane %v587_v52, %v3795_v60  ;;  %v602_v6 = vrot.slane %v588_v53, %v3795_v60  ;;  %v331_v21 = vrot.slane %v323_v24, %v3795_v60  ;;  %v338_v29 = vrot.slane %v324_v25, %v3795_v60 }
 0x1ee   :  { %v623_v63 = vcombine.low %v529_v54, %v545_v56  ;;  %v631_v0 = vcombine.low %v536_v55, %v552_v57  ;;  %v3239_v2 = vcombine.high %v529_v54, %v545_v56  ;;  %v3240_v3 = vcombine.high %v536_v55, %v552_v57 }
 0x1ef   :  { %v611_v7 = vrot.slane %v603_v61, %v3795_v60  ;;  %v618_v9 = vrot.slane %v604_v62, %v3795_v60  ;;  %v366_v47 = vrot.slane %v359_v30, %v3795_v60  ;;  %v391_v48 = vrot.slane %v384_v31, %v3795_v60 }
 0x1f0   :  { %v630_v10 = vrot.slane %v623_v63, %v3723_v8  ;;  %v638_v11 = vrot.slane %v631_v0, %v3723_v8  ;;  %v655_v12 = vrot.slane %v3239_v2, %v3723_v8  ;;  %v663_v13 = vrot.slane %v3240_v3, %v3723_v8 }
 0x1f1   :  { %v673_v14 = vcombine.low %v595_v4, %v611_v7  ;;  %v681_v15 = vcombine.low %v602_v6, %v618_v9  ;;  %v3241_v16 = vcombine.high %v595_v4, %v611_v7  ;;  %v3242_v17 = vcombine.high %v602_v6, %v618_v9 }
 0x1f2   :  { %v639_v18 = vcombine.low %v630_v10, %v638_v11  ;;  %v664_v19 = vcombine.low %v655_v12, %v663_v13  ;;  %v315_v49 = vrot.slane %v307_v22, %v3795_v60  ;;  %v322_v50 = vrot.slane %v308_v23, %v3795_v60 }
 0x1f3   :  { %v680_v32 = vrot.slane %v673_v14, %v3723_v8  ;;  %v688_v33 = vrot.slane %v681_v15, %v3723_v8  ;;  %v705_v34 = vrot.slane %v3241_v16, %v3723_v8  ;;  %v713_v20 = vrot.slane %v3242_v17, %v3723_v8 }
 0x1f4   :  { %v646_v26 = vrot.slane %v639_v18, %v3795_v60  ;;  %v671_v27 = vrot.slane %v664_v19, %v3795_v60  ;;  %v393_v56 = vcombine.low %v315_v49, %v331_v21  ;;  %v401_v57 = vcombine.low %v322_v50, %v338_v29 }
 0x1f5   :  { %v689_v51 = vcombine.low %v680_v32, %v688_v33  ;;  %v714_v55 = vcombine.low %v705_v34, %v713_v20  ;;  %v3237_v58 = vcombine.high %v315_v49, %v331_v21  ;;  %v3238_v59 = vcombine.high %v322_v50, %v338_v29 }
 0x1f6   :  { %v725_v28 = vpack.i.b16 %v671_v27, %v646_v26  ;;  %v726_v39 = vshrl.u32 %v646_v26, 16  ;;  %v727_v42 = vshrl.u32 %v671_v27, 16  ;;  %v647_v43 = vcombine.high %v646_v26, %v3612_v40 }
 0x1f7   :  { %v672_v44 = vcombine.high %v671_v27, %v3612_v40  ;;  %v446_v62 = vshrl.u32 %v366_v47, 16  ;;  %v447_v63 = vshrl.u32 %v391_v48, 16  ;;  %v445_v0 = vpack.i.b16 %v391_v48, %v366_v47 }
 0x1f8   :  { %v1032_v45 = vsel %vm1027_vm2, %v725_v28, 0  ;;  %v728_v46 = vpack.i.b16 %v727_v42, %v726_v39  ;;  %v732_v53 = vshrl.u32 %v647_v43, 16  ;;  %v696_v3 = vrot.slane %v689_v51, %v3795_v60 }
 0x1f9   :  { %3336 = vmatpush3.bf16.xpose.msra.mxu1 %v1032_v45  ;;  %v733_v54 = vshrl.u32 %v672_v44, 16  ;;  %v731_v61 = vpack.i.b16 %v672_v44, %v647_v43  ;;  %v721_v4 = vrot.slane %v714_v55, %v3795_v60  ;;  %v400_v6 = vrot.slane %v393_v56, %v3723_v8 }
 0x1fa   :  { %v1078_v52 = vsel %vm1027_vm2, %v728_v46, 0  ;;  %3347 = vmatprep.subr.bf16.mxu1 %v3605_v1  ;;  %v408_v7 = vrot.slane %v401_v57, %v3723_v8  ;;  %v425_v9 = vrot.slane %v3237_v58, %v3723_v8  ;;  %v433_v10 = vrot.slane %v3238_v59, %v3723_v8 }
 0x1fb   :  { %3342 = vmatpush3.bf16.xpose.msra.mxu0 %v1078_v52  ;;  %v734_v2 = vpack.i.b16 %v733_v54, %v732_v53  ;;  %v1124_v11 = vsel %vm1027_vm2, %v731_v61, 0  ;;  %v448_v12 = vpack.i.b16 %v447_v63, %v446_v62  ;;  %v367_v13 = vcombine.high %v366_v47, %v3612_v40 }
 0x1fc   :  { %3353 = vmatprep.subr.bf16.mxu0 %v3605_v1  ;;  %v392_v14 = vcombine.high %v391_v48, %v3612_v40  ;;  %v738_v16 = vshrl.u32 %v696_v3, 16  ;;  %v739_v17 = vshrl.u32 %v721_v4, 16  ;;  %v409_v18 = vcombine.low %v400_v6, %v408_v7 }
 0x1fd   :  { %v1170_v15 = vsel %vm1027_vm2, %v734_v2, 0  ;;  %v737_v19 = vpack.i.b16 %v721_v4, %v696_v3  ;;  %v452_v22 = vshrl.u32 %v367_v13, 16  ;;  %v434_v24 = vcombine.low %v425_v9, %v433_v10 }
 0x1fe   :  { %v453_v23 = vshrl.u32 %v392_v14, 16  ;;  %v451_v25 = vpack.i.b16 %v392_v14, %v367_v13  ;;  %v740_v26 = vpack.i.b16 %v739_v17, %v738_v16  ;;  %v697_v27 = vcombine.high %v696_v3, %v3612_v40 }
 0x1ff   :  { %v722_v30 = vcombine.high %v721_v4, %v3612_v40  ;;  %v1216_v31 = vsel %vm1027_vm2, %v737_v19, 0  ;;  %v416_v33 = vrot.slane %v409_v18, %v3795_v60  ;;  %v441_v34 = vrot.slane %v434_v24, %v3795_v60 }
 0x200   :  { %3338 = vmatmul.mubr.msk.bf16.vlgmr.msra.gmra.mrb[0].mxu1 %vm1027_vm2, %v445_v0  ;;  %v454_v32 = vpack.i.b16 %v453_v23, %v452_v22  ;;  %v1262_v20 = vsel %vm1027_vm2, %v740_v26, 0  ;;  %v744_v28 = vshrl.u32 %v697_v27, 16 }
 0x201   :  { %3348 = vmatpush3.bf16.xpose.msra.mxu1 %v1124_v11  ;;  %3349 = vmatprep.mubr.msk.bf16.mxu1 %vm3606_vm0, %v3605_v1  ;;  %v745_v39 = vshrl.u32 %v722_v30, 16  ;;  %v743_v42 = vpack.i.b16 %v722_v30, %v697_v27  ;;  %v458_v43 = vshrl.u32 %v416_v33, 16  ;;  %v459_v21 = vshrl.u32 %v441_v34, 16 }
 0x202   :  { %3344 = vmatmul.mubr.msk.bf16.vlgmr.msra.gmra.mrb[4].mxu0 %vm1027_vm2, %v448_v12  ;;  %3359 = vmatprep.subr.bf16.mxu1 %v3605_v1  ;;  %v457_v29 = vpack.i.b16 %v441_v34, %v416_v33  ;;  %v417_v47 = vcombine.high %v416_v33, %v3612_v40  ;;  %v442_v48 = vcombine.high %v441_v34, %v3612_v40 }
 0x203   :  { %3354 = vmatpush3.bf16.xpose.msra.mxu0 %v1170_v15  ;;  %3355 = vmatprep.mubr.msk.bf16.mxu0 %vm3606_vm0, %v3605_v1  ;;  %v746_v44 = vpack.i.b16 %v745_v39, %v744_v28  ;;  %v1308_v45 = vsel %vm1027_vm2, %v743_v42, 0  ;;  %v460_v46 = vpack.i.b16 %v459_v21, %v458_v43 }
 0x204   :  { %3365 = vmatprep.subr.bf16.mxu0 %v3605_v1  ;;  %v464_v50 = vshrl.u32 %v417_v47, 16  ;;  %v465_v51 = vshrl.u32 %v442_v48, 16  ;;  %v463_v52 = vpack.i.b16 %v442_v48, %v417_v47 }
 0x205   :  { %v1354_v49 = vsel %vm1027_vm2, %v746_v44, 0 }
 0x206   :  { %v466_v53 = vpack.i.b16 %v465_v51, %v464_v50 }
 0x208   :  { %3350 = vmatmul.mubr.msk.bf16.vlgmr.msra.gmra.mrb[4].mxu1 %vm1027_vm2, %v451_v25 }
 0x209   :  { %3360 = vmatpush3.bf16.xpose.msra.mxu1 %v1216_v31  ;;  %3361 = vmatprep.mubr.msk.bf16.mxu1 %vm3606_vm0, %v3605_v1 }
 0x20a   :  { %3356 = vmatmul.mubr.msk.bf16.vlgmr.msra.gmra.mrb[8].mxu0 %vm1027_vm2, %v454_v32  ;;  %3371 = vmatprep.subr.bf16.mxu1 %v3605_v1 }
 0x20b   :  { %3366 = vmatpush3.bf16.xpose.msra.mxu0 %v1262_v20  ;;  %3367 = vmatprep.mubr.msk.bf16.mxu0 %vm3606_vm0, %v3605_v1 }
 0x20c   :  { %3377 = vmatprep.subr.bf16.mxu0 %v3605_v1 }
 0x210   :  { %3362 = vmatmul.mubr.msk.bf16.vlgmr.msra.gmra.mrb[8].mxu1 %vm1027_vm2, %v457_v29 }
 0x211   :  { %3372 = vmatpush3.bf16.xpose.msra.mxu1 %v1308_v45  ;;  %3373 = vmatprep.mubr.msk.bf16.mxu1 %vm3606_vm0, %v3605_v1 }
 0x212   :  { %3368 = vmatmul.mubr.msk.bf16.vlgmr.msra.gmra.mrb[12].mxu0 %vm1027_vm2, %v460_v46  ;;  %3383 = vmatprep.subr.bf16.mxu1 %v3605_v1 }
 0x213   :  { %3378 = vmatpush3.bf16.xpose.msra.mxu0 %v1354_v49  ;;  %3379 = vmatprep.mubr.msk.bf16.mxu0 %vm3606_vm0, %v3605_v1 }
 0x214   :  { %3389 = vmatprep.subr.bf16.mxu0 %v3605_v1 }
 0x218   :  { %3374 = vmatmul.mubr.msk.bf16.vlgmr.msra.gmra.mrb[12].mxu1 %vm1027_vm2, %v463_v52 }
 0x219   :  { %3385 = vmatprep.mubr.msk.bf16.mxu1 %vm3606_vm0, %v3605_v1 }
 0x21a   :  { %3380 = vmatmul.mubr.msk.bf16.vlgmr.msra.gmra.mrb[16].mxu0 %vm1027_vm2, %v466_v53 }
 0x21b   :  { %3391 = vmatprep.mubr.msk.bf16.mxu0 %vm3606_vm0, %v3605_v1 }
 0x2d3   :  { %v1068_v54 = vpop.f32.mrb[0].mxu1 }
 0x2d4   :  { %v3339_v55 = vpop.f32.mrb[1].mxu1  ;;  %v1396_v56 = vsel %vm1027_vm2, %v1068_v54, -inf }
 0x2d5   :  { %1397 = vmax.xlane.f32.xlu1 %v1396_v56  ;;  %v1071_v57 = vpop.f32.mrb[2].mxu1  ;;  %v1114_v58 = vpop.f32.mrb[4].mxu0 }
 0x2d6   :  { %v3340_v59 = vpop.f32.mrb[3].mxu1  ;;  %v3345_v61 = vpop.f32.mrb[5].mxu0  ;;  %v1399_v62 = vsel %vm1027_vm2, %v1114_v58, -inf }
 0x2d7   :  { %1400 = vmax.xlane.f32.xlu0 %v1399_v62  ;;  %v1117_v63 = vpop.f32.mrb[6].mxu0 }
 0x2d8   :  { %v3346_v0 = vpop.f32.mrb[7].mxu0 }
 0x2db   :  { %v3921_v2 = vpop.f32.mrb[4].mxu1 }
 0x2dc   :  { %v3351_v3 = vpop.f32.mrb[5].mxu1  ;;  %v1402_v4 = vsel %vm1027_vm2, %v3921_v2, -inf }
 0x2dd   :  { %v1163_v6 = vpop.f32.mrb[6].mxu1  ;;  %1403 = vmax.xlane.f32.xlu0 %v1402_v4  ;;  %v1206_v7 = vpop.f32.mrb[8].mxu0 }
 0x2de   :  { %v3352_v9 = vpop.f32.mrb[7].mxu1  ;;  %v3357_v10 = vpop.f32.mrb[9].mxu0  ;;  %v1405_v11 = vsel %vm1027_vm2, %v1206_v7, -inf }
 0x2df   :  { %1406 = vmax.xlane.f32.xlu1 %v1405_v11  ;;  %v1209_v12 = vpop.f32.mrb[10].mxu0 }
 0x2e0   :  { %v3358_v13 = vpop.f32.mrb[11].mxu0 }
 0x2e3   :  { %v1252_v14 = vpop.f32.mrb[8].mxu1 }
 0x2e4   :  { %v3363_v15 = vpop.f32.mrb[9].mxu1  ;;  %v1408_v16 = vsel %vm1027_vm2, %v1252_v14, -inf }
 0x2e5   :  { %v1255_v17 = vpop.f32.mrb[10].mxu1  ;;  %1409 = vmax.xlane.f32.xlu0 %v1408_v16  ;;  %v1298_v18 = vpop.f32.mrb[12].mxu0 }
 0x2e6   :  { %v3364_v19 = vpop.f32.mrb[11].mxu1  ;;  %v3369_v22 = vpop.f32.mrb[13].mxu0  ;;  %v1411_v23 = vsel %vm1027_vm2, %v1298_v18, -inf }
 0x2e7   :  { %1412 = vmax.xlane.f32.xlu1 %v1411_v23  ;;  %v1301_v24 = vpop.f32.mrb[14].mxu0 }
 0x2e8   :  { %v3370_v25 = vpop.f32.mrb[15].mxu0 }
 0x2eb   :  { %v1344_v26 = vpop.f32.mrb[12].mxu1 }
 0x2ec   :  { %v3375_v27 = vpop.f32.mrb[13].mxu1  ;;  %v1414_v30 = vsel %vm1027_vm2, %v1344_v26, -inf }
 0x2ed   :  { %v1347_v31 = vpop.f32.mrb[14].mxu1  ;;  %1415 = vmax.xlane.f32.xlu0 %v1414_v30  ;;  %v1390_v32 = vpop.f32.mrb[16].mxu0 }
 0x2ee   :  { %v3376_v33 = vpop.f32.mrb[15].mxu1  ;;  %v3381_v34 = vpop.f32.mrb[17].mxu0  ;;  %v1417_v20 = vsel %vm1027_vm2, %v1390_v32, -inf }
 0x2ef   :  { %1418 = vmax.xlane.f32.xlu1 %v1417_v20  ;;  %v1393_v28 = vpop.f32.mrb[18].mxu0 }
 0x2f0   :  { %v3382_v39 = vpop.f32.mrb[19].mxu0 }
 0x300   :  { %749 = vrot.lane.b32.xlu1 %v3767_v36, %s3603_s18 }
 0x303   :  { %747 = vrot.lane.b32.xlu0 %v3761_v35, %s3603_s18 }
 0x362   :  { %v1398_v42 = vpop.xlane.xlu1 %1397 }
 0x363   :  { %v1420_v43 = vsub.f32 %v1068_v54, %v1398_v42 }
 0x364   :  { %v1401_v21 = vpop.xlane.xlu0 %1400 }
 0x365   :  { %v1428_v29 = vmul.f32 1.442695, %v1420_v43  ;;  %v1421_v44 = vsub.f32 %v1114_v58, %v1401_v21 }
 0x367   :  { %3506 = vpow2.f32 %v1428_v29  ;;  %v1430_v45 = vmul.f32 1.442695, %v1421_v44 }
 0x369   :  { %3508 = vpow2.f32 %v1430_v45 }
 0x36a   :  { %v1404_v35 = vpop.xlane.xlu0 %1403 }
 0x36b   :  { %v1422_v52 = vsub.f32 %v3921_v2, %v1404_v35 }
 0x36c   :  { %v1407_v49 = vpop.xlane.xlu1 %1406 }
 0x36d   :  { %v1423_v50 = vsub.f32 %v1206_v7, %v1407_v49  ;;  %v1432_v57 = vmul.f32 1.442695, %v1422_v52 }
 0x36f   :  { %v1434_v54 = vmul.f32 1.442695, %v1423_v50 }
 0x371   :  { %v3934_v46 = vpop.eup %3506  ;;  %3510 = vpow2.f32 %v1434_v54 }
 0x372   :  { %v1444_v47 = vsel %vm1027_vm2, %v3934_v46, 0.0  ;;  %v1410_v51 = vpop.xlane.xlu0 %1409  ;;  %3512 = vpow2.f32 %v1432_v57 }
 0x373   :  { %v3938_v48 = vpop.eup %3508  ;;  %1445 = vadd.xlane.f32.xlu0 %v1444_v47  ;;  %v1424_v55 = vsub.f32 %v1252_v14, %v1410_v51 }
 0x374   :  { %v1447_v36 = vsel %vm1027_vm2, %v3938_v48, 0.0  ;;  %v1413_v53 = vpop.xlane.xlu1 %1412 }
 0x375   :  { %1448 = vadd.xlane.f32.xlu1 %v1447_v36  ;;  %v1425_v58 = vsub.f32 %v1298_v18, %v1413_v53  ;;  %v1436_v61 = vmul.f32 1.442695, %v1424_v55 }
 0x377   :  { %3514 = vpow2.f32 %v1436_v61 }
 0x37a   :  { %v1416_v56 = vpop.xlane.xlu0 %1415 }
 0x37b   :  { %v1426_v62 = vsub.f32 %v1344_v26, %v1416_v56  ;;  %v3947_v3 = vpop.eup %3510 }
 0x37c   :  { %v1419_v59 = vpop.xlane.xlu1 %1418  ;;  %v3949_v2 = vpop.eup %3512  ;;  %v1453_v4 = vsel %vm1027_vm2, %v3947_v3, 0.0 }
 0x37d   :  { %v1427_v63 = vsub.f32 %v1390_v32, %v1419_v59  ;;  %v1450_v7 = vsel %vm1027_vm2, %v3949_v2, 0.0 }
 0x37e   :  { %v748_v16 = vpop.permute.xlu0 %747 }
 0x37f   :  { %v1442_v0 = vmul.f32 1.442695, %v1427_v63 }
 0x380   :  { %v750_v17 = vpop.permute.xlu1 %749 }
 0x381   :  { %v3953_v6 = vpop.eup %3514  ;;  %v757_v19 = vpack.i.b16 %v750_v17, %v748_v16  ;;  %v760_v56 = vshrl.u32 %v750_v17, 16 }
 0x382   :  { %v1456_v10 = vsel %vm1027_vm2, %v3953_v6, 0.0 }
 0x383   :  { %v771_v23 = vcombine.high %v757_v19, %v3780_v41  ;;  %v778_v27 = vrot.slane %v757_v19, %v3723_v8 }
 0x385   :  { %v785_v32 = vrot.slane %v771_v23, %v3723_v8 }
 0x386   :  { %751 = vrot.lane.b32.xlu1 %v3772_v38, %s3603_s18  ;;  %v1438_v38 = vmul.f32 1.442695, %v1425_v58 }
 0x388   :  { %3516 = vpow2.f32 %v1438_v38 }
 0x389   :  { %753 = vrot.lane.b32.xlu0 %v3770_v37, %s3603_s18  ;;  %v1440_v37 = vmul.f32 1.442695, %v1426_v62  ;;  %v759_v62 = vshrl.u32 %v748_v16, 16 }
 0x38b   :  { %3518 = vpow2.f32 %v1440_v37 }
 0x38c   :  { %3520 = vpow2.f32 %v1442_v0 }
 0x392   :  { %v3957_v9 = vpop.eup %3516 }
 0x393   :  { %v1459_v12 = vsel %vm1027_vm2, %v3957_v9, 0.0 }
 0x395   :  { %v3961_v11 = vpop.eup %3518 }
 0x396   :  { %v3965_v13 = vpop.eup %3520  ;;  %v1462_v14 = vsel %vm1027_vm2, %v3961_v11, 0.0 }
 0x397   :  { %v1465_v15 = vsel %vm1027_vm2, %v3965_v13, 0.0 }
 0x3a8   :  { %1454 = vadd.xlane.f32.xlu0 %v1453_v4 }
 0x3aa   :  { %1451 = vadd.xlane.f32.xlu1 %v1450_v7 }
 0x3ac   :  { %1457 = vadd.xlane.f32.xlu0 %v1456_v10  ;;  %v761_v10 = vpack.i.b16 %v760_v56, %v759_v62 }
 0x3ae   :  { %1460 = vadd.xlane.f32.xlu1 %v1459_v12 }
 0x3b0   :  { %1463 = vadd.xlane.f32.xlu0 %v1462_v14 }
 0x3b2   :  { %1466 = vadd.xlane.f32.xlu1 %v1465_v15 }
 0x400   :  { %v1446_v18 = vpop.xlane.xlu0 %1445 }
 0x401   :  { %3522 = vrcp.f32 %v1446_v18 }
 0x402   :  { %v1449_v22 = vpop.xlane.xlu1 %1448 }
 0x403   :  { %3524 = vrcp.f32 %v1449_v22 }
 0x404   :  { %v754_v24 = vpop.permute.xlu0 %753 }
 0x405   :  { %v768_v57 = vshrl.u32 %v754_v24, 16 }
 0x406   :  { %v752_v25 = vpop.permute.xlu1 %751 }
 0x407   :  { %v765_v26 = vpack.i.b16 %v754_v24, %v752_v25  ;;  %v767_v52 = vshrl.u32 %v752_v25, 16  ;;  %v837_v25 = vcombine.high %v761_v10, %v3780_v41 }
 0x409   :  { %v786_v30 = vcombine.high %v765_v26, %v3780_v41  ;;  %v793_v31 = vrot.slane %v765_v26, %v3723_v8  ;;  %v769_v63 = vpack.i.b16 %v768_v57, %v767_v52 }
 0x40b   :  { %v800_v33 = vrot.slane %v786_v30, %v3723_v8  ;;  %v801_v34 = vcombine.low %v778_v27, %v793_v31  ;;  %v802_v20 = vcombine.high %v778_v27, %v793_v31  ;;  %v3523_v53 = vpop.eup %3522  ;;  %v859_v31 = vrot.slane %v769_v63, %v3723_v8 }
 0x40c   :  { %v1476_v38 = vmul.f32 %v3523_v53, %v3934_v46  ;;  %v852_v46 = vcombine.high %v769_v63, %v3780_v41  ;;  %v851_v41 = vrot.slane %v837_v25, %v3723_v8 }
 0x40d   :  { %v817_v28 = vcombine.low %v785_v32, %v800_v33  ;;  %v818_v39 = vcombine.high %v785_v32, %v800_v33  ;;  %v809_v42 = vrot.slane %v801_v34, %v3795_v60  ;;  %v816_v43 = vrot.slane %v802_v20, %v3795_v60  ;;  %v3525_v61 = vpop.eup %3524 }
 0x40e   :  { %v1477_v14 = vmul.f32 %v3525_v61, %v3938_v48  ;;  %v1484_v23 = vpack.c.bf16 %v1476_v38, %v1476_v38  ;;  %v866_v27 = vrot.slane %v852_v46, %v3723_v8  ;;  %v844_v32 = vrot.slane %v761_v10, %v3723_v8 }
 0x40f   :  { %v825_v21 = vrot.slane %v817_v28, %v3795_v60  ;;  %v832_v29 = vrot.slane %v818_v39, %v3795_v60 }
 0x410   :  { %v1485_v26 = vpack.c.bf16 %v1477_v14, %v1477_v14  ;;  %v883_v33 = vcombine.low %v851_v41, %v866_v27  ;;  %v884_v34 = vcombine.high %v851_v41, %v866_v27  ;;  %v867_v20 = vcombine.low %v844_v32, %v859_v31 }
 0x411   :  { %v903_v44 = vcombine.low %v809_v42, %v825_v21  ;;  %v911_v45 = vcombine.low %v816_v43, %v832_v29  ;;  %v3243_v47 = vcombine.high %v809_v42, %v825_v21  ;;  %v3244_v36 = vcombine.high %v816_v43, %v832_v29 }
 0x412   :  { %v868_v28 = vcombine.high %v844_v32, %v859_v31  ;;  %v891_v39 = vrot.slane %v883_v33, %v3795_v60  ;;  %v898_v42 = vrot.slane %v884_v34, %v3795_v60  ;;  %v875_v43 = vrot.slane %v867_v20, %v3795_v60 }
 0x413   :  { %v910_v35 = vrot.slane %v903_v44, %v3723_v8  ;;  %v918_v49 = vrot.slane %v911_v45, %v3723_v8  ;;  %v935_v50 = vrot.slane %v3243_v47, %v3723_v8  ;;  %v943_v51 = vrot.slane %v3244_v36, %v3723_v8 }
 0x414   :  { %v882_v21 = vrot.slane %v868_v28, %v3795_v60  ;;  %v953_v29 = vcombine.low %v875_v43, %v891_v39  ;;  %v3245_v45 = vcombine.high %v875_v43, %v891_v39 }
 0x415   :  { %v919_v54 = vcombine.low %v910_v35, %v918_v49  ;;  %v944_v55 = vcombine.low %v935_v50, %v943_v51 }
 0x416   :  { %v961_v44 = vcombine.low %v882_v21, %v898_v42  ;;  %v3246_v47 = vcombine.high %v882_v21, %v898_v42  ;;  %v960_v36 = vrot.slane %v953_v29, %v3723_v8  ;;  %v985_v49 = vrot.slane %v3245_v45, %v3723_v8 }
 0x417   :  { %v926_v58 = vrot.slane %v919_v54, %v3795_v60  ;;  %v951_v59 = vrot.slane %v944_v55, %v3795_v60 }
 0x418   :  { %v968_v35 = vrot.slane %v961_v44, %v3723_v8  ;;  %v993_v50 = vrot.slane %v3246_v47, %v3723_v8 }
 0x419   :  { %v1005_v37 = vpack.i.b16 %v951_v59, %v926_v58  ;;  %v1006_v0 = vshrl.u32 %v926_v58, 16  ;;  %v1007_v4 = vshrl.u32 %v951_v59, 16  ;;  %v927_v7 = vcombine.high %v926_v58, %v3612_v40 }
 0x41a   :  { %v952_v12 = vcombine.high %v951_v59, %v3612_v40  ;;  %v969_v52 = vcombine.low %v960_v36, %v968_v35  ;;  %v994_v53 = vcombine.low %v985_v49, %v993_v50 }
 0x41b   :  { %v1497_v15 = vsel %vm1495_vm3, %v1005_v37, 0  ;;  %v1008_v17 = vpack.i.b16 %v1007_v4, %v1006_v0  ;;  %v1012_v18 = vshrl.u32 %v927_v7, 16 }
 0x41c   :  { %3384 = vmatpush3.bf16.msra.mxu1 %v1497_v15  ;;  %v1011_v16 = vpack.i.b16 %v952_v12, %v927_v7  ;;  %v1013_v19 = vshrl.u32 %v952_v12, 16  ;;  %v976_v56 = vrot.slane %v969_v52, %v3795_v60  ;;  %v1001_v57 = vrot.slane %v994_v53, %v3795_v60 }
 0x41d   :  { %v1543_v22 = vsel %vm1495_vm3, %v1008_v17, 0  ;;  %3395 = vmatprep.subr.bf16.mxu1 %v3605_v1 }
 0x41e   :  { %3390 = vmatpush3.bf16.msra.mxu0 %v1543_v22  ;;  %v1014_v24 = vpack.i.b16 %v1013_v19, %v1012_v18  ;;  %v1589_v48 = vsel %vm1495_vm3, %v1011_v16, 0  ;;  %v1018_v59 = vshrl.u32 %v976_v56, 16  ;;  %v1019_v61 = vshrl.u32 %v1001_v57, 16 }
 0x41f   :  { %3386 = vmatmul.mubr.msk.bf16.vlgmr.msra.gmra.mrb[16].mxu1 %vm1027_vm2, %v1484_v23  ;;  %3401 = vmatprep.subr.bf16.mxu0 %v3605_v1  ;;  %v977_v4 = vcombine.high %v976_v56, %v3612_v40  ;;  %v1002_v7 = vcombine.high %v1001_v57, %v3612_v40  ;;  %v1017_v15 = vpack.i.b16 %v1001_v57, %v976_v56 }
 0x420   :  { %3396 = vmatpush3.bf16.msra.mxu1 %v1589_v48  ;;  %3397 = vmatprep.mubr.msk.bf16.mxu1 %vm3606_vm0, %v3605_v1  ;;  %v1635_v30 = vsel %vm1495_vm3, %v1014_v24, 0  ;;  %v1020_v0 = vpack.i.b16 %v1019_v61, %v1018_v59 }
 0x421   :  { %3392 = vmatmul.mubr.msk.bf16.vlgmr.msra.gmra.mrb[20].mxu0 %vm1027_vm2, %v1485_v26  ;;  %3407 = vmatprep.subr.bf16.mxu1 %v3605_v1  ;;  %v1025_v19 = vshrl.u32 %v1002_v7, 16  ;;  %v1023_v25 = vpack.i.b16 %v1002_v7, %v977_v4 }
 0x422   :  { %3402 = vmatpush3.bf16.msra.mxu0 %v1635_v30  ;;  %3403 = vmatprep.mubr.msk.bf16.mxu0 %vm3606_vm0, %v3605_v1  ;;  %v1727_v18 = vsel %vm1495_vm3, %v1020_v0, 0 }
 0x423   :  { %3413 = vmatprep.subr.bf16.mxu0 %v3605_v1 }
 0x435   :  { %v1455_v51 = vpop.xlane.xlu0 %1454 }
 0x436   :  { %3526 = vrcp.f32 %v1455_v51 }
 0x437   :  { %v1452_v54 = vpop.xlane.xlu1 %1451 }
 0x438   :  { %3528 = vrcp.f32 %v1452_v54 }
 0x439   :  { %v1458_v55 = vpop.xlane.xlu0 %1457 }
 0x43a   :  { %3530 = vrcp.f32 %v1458_v55 }
 0x43b   :  { %v1461_v58 = vpop.xlane.xlu1 %1460 }
 0x43c   :  { %3532 = vrcp.f32 %v1461_v58 }
 0x43d   :  { %v1464_v37 = vpop.xlane.xlu0 %1463 }
 0x43f   :  { %v1467_v62 = vpop.xlane.xlu1 %1466 }
 0x440   :  { %v3527_v38 = vpop.eup %3526  ;;  %3534 = vrcp.f32 %v1467_v62 }
 0x441   :  { %v1479_v63 = vmul.f32 %v3527_v38, %v3947_v3  ;;  %3536 = vrcp.f32 %v1464_v37  ;;  %v1024_v3 = vshrl.u32 %v977_v4, 16 }
 0x442   :  { %v3529_v10 = vpop.eup %3528 }
 0x443   :  { %v1478_v12 = vmul.f32 %v3529_v10, %v3949_v2  ;;  %v1487_v14 = vpack.c.bf16 %v1479_v63, %v1479_v63  ;;  %v1681_v2 = vsel %vm1495_vm3, %v1017_v15, 0  ;;  %v1026_v23 = vpack.i.b16 %v1025_v19, %v1024_v3 }
 0x444   :  { %v3531_v17 = vpop.eup %3530 }
 0x445   :  { %3404 = vmatmul.mubr.msk.bf16.vlgmr.msra.gmra.mrb[24].mxu0 %vm1027_vm2, %v1487_v14  ;;  %v1486_v16 = vpack.c.bf16 %v1478_v12, %v1478_v12  ;;  %v1480_v22 = vmul.f32 %v3531_v17, %v3953_v6  ;;  %v1773_v6 = vsel %vm1495_vm3, %v1023_v25, 0 }
 0x446   :  { %v3533_v46 = vpop.eup %3532  ;;  %3414 = vmatpush3.bf16.msra.mxu0 %v1727_v18  ;;  %3415 = vmatprep.mubr.msk.bf16.mxu0 %vm3606_vm0, %v3605_v1 }
 0x447   :  { %v1481_v40 = vmul.f32 %v3533_v46, %v3957_v9  ;;  %3398 = vmatmul.mubr.msk.bf16.vlgmr.msra.gmra.mrb[20].mxu1 %vm1027_vm2, %v1486_v16  ;;  %3425 = vmatprep.subr.bf16.mxu0 %v3605_v1  ;;  %v1819_v9 = vsel %vm1495_vm3, %v1026_v23, 0  ;;  %v1488_v26 = vpack.c.bf16 %v1480_v22, %v1480_v22 }
 0x448   :  { %3408 = vmatpush3.bf16.msra.mxu1 %v1681_v2  ;;  %3409 = vmatprep.mubr.msk.bf16.mxu1 %vm3606_vm0, %v3605_v1 }
 0x449   :  { %3419 = vmatprep.subr.bf16.mxu1 %v3605_v1  ;;  %v1489_v24 = vpack.c.bf16 %v1481_v40, %v1481_v40 }
 0x44a   :  { %v3535_v48 = vpop.eup %3534 }
 0x44b   :  { %v3537_v27 = vpop.eup %3536  ;;  %v1483_v30 = vmul.f32 %v3535_v48, %v3965_v13 }
 0x44c   :  { %v1482_v41 = vmul.f32 %v3537_v27, %v3961_v11 }
 0x44d   :  { %3416 = vmatmul.mubr.msk.bf16.vlgmr.msra.gmra.mrb[28].mxu0 %vm1027_vm2, %v1489_v24  ;;  %v1491_v31 = vpack.c.bf16 %v1483_v30, %v1483_v30 }
 0x44e   :  { %3426 = vmatpush3.bf16.msra.mxu0 %v1819_v9  ;;  %3427 = vmatprep.mubr.msk.bf16.mxu0 %vm3606_vm0, %v3605_v1  ;;  %v1490_v32 = vpack.c.bf16 %v1482_v41, %v1482_v41 }
 0x44f   :  { %3410 = vmatmul.mubr.msk.bf16.vlgmr.msra.gmra.mrb[24].mxu1 %vm1027_vm2, %v1488_v26  ;;  %3439 = vmatprep.subr.bf16.mxu0 %v3605_v1 }
 0x450   :  { %3420 = vmatpush3.bf16.msra.mxu1 %v1773_v6  ;;  %3421 = vmatprep.mubr.msk.bf16.mxu1 %vm3606_vm0, %v3605_v1 }
 0x451   :  { %3431 = vmatprep.subr.bf16.mxu1 %v3605_v1 }
 0x455   :  { %3428 = vmatmul.mubr.msk.bf16.vlgmr.msra.gmra.mrb[32].mxu0 %vm1027_vm2, %v1491_v31 }
 0x456   :  { %3443 = vmatprep.mubr.msk.bf16.mxu0 %vm3606_vm0, %v3605_v1 }
 0x457   :  { %3422 = vmatmul.mubr.msk.bf16.vlgmr.msra.gmra.mrb[28].mxu1 %vm1027_vm2, %v1490_v32 }
 0x458   :  { %3435 = vmatprep.mubr.msk.bf16.mxu1 %vm3606_vm0, %v3605_v1 }
 0x4f2   :  { %v1533_v13 = vpop.f32.mrb[16].mxu1 }
 0x4f3   :  { %v3387_v33 = vpop.f32.mrb[17].mxu1 }
 0x4f4   :  { %v1536_v34 = vpop.f32.mrb[18].mxu1  ;;  %v1579_v20 = vpop.f32.mrb[20].mxu0 }
 0x4f5   :  { %v3388_v28 = vpop.f32.mrb[19].mxu1  ;;  %v3393_v11 = vpop.f32.mrb[21].mxu0 }
 0x4f6   :  { %v1582_v39 = vpop.f32.mrb[22].mxu0 }
 0x4f7   :  { %v3394_v42 = vpop.f32.mrb[23].mxu0 }
 0x518   :  { %v1671_v43 = vpop.f32.mrb[24].mxu0 }
 0x519   :  { %v1877_v21 = vcombine.low %v1579_v20, %v1671_v43  ;;  %v1878_v29 = vcombine.high %v1579_v20, %v1671_v43  ;;  %v3405_v44 = vpop.f32.mrb[25].mxu0 }
 0x51a   :  { %v1625_v45 = vpop.f32.mrb[20].mxu1  ;;  %v1674_v47 = vpop.f32.mrb[26].mxu0 }
 0x51b   :  { %v1861_v36 = vcombine.low %v1533_v13, %v1625_v45  ;;  %v1862_v35 = vcombine.high %v1533_v13, %v1625_v45  ;;  %v3399_v49 = vpop.f32.mrb[21].mxu1  ;;  %v3406_v50 = vpop.f32.mrb[27].mxu0  ;;  %v1885_v52 = vrot.slane %v1877_v21, %v3723_v8  ;;  %v1892_v53 = vrot.slane %v1878_v29, %v3723_v8 }
 0x51c   :  { %v1628_v51 = vpop.f32.mrb[22].mxu1 }
 0x51d   :  { %v1869_v54 = vrot.slane %v1861_v36, %v3723_v8  ;;  %v1876_v55 = vrot.slane %v1862_v35, %v3723_v8  ;;  %v3400_v56 = vpop.f32.mrb[23].mxu1 }
 0x51f   :  { %v1893_v57 = vcombine.low %v1869_v54, %v1885_v52  ;;  %v1894_v58 = vcombine.high %v1869_v54, %v1885_v52  ;;  %v1909_v59 = vcombine.low %v1876_v55, %v1892_v53  ;;  %v1910_v61 = vcombine.high %v1876_v55, %v1892_v53 }
 0x520   :  { %v1763_v62 = vpop.f32.mrb[28].mxu0 }
 0x521   :  { %v3417_v38 = vpop.f32.mrb[29].mxu0  ;;  %v1901_v18 = vrot.slane %v1893_v57, %v3795_v60  ;;  %v1908_v16 = vrot.slane %v1894_v58, %v3795_v60  ;;  %v1917_v3 = vrot.slane %v1909_v59, %v3795_v60  ;;  %v1924_v19 = vrot.slane %v1910_v61, %v3795_v60  ;;  %v3498_v57 = vld [vmem:[%s4321_s3] sm:$0xff]  }
 0x522   :  { %v1717_v63 = vpop.f32.mrb[24].mxu1  ;;  %v1766_v37 = vpop.f32.mrb[30].mxu0  ;;  %3432 = vmatpush3.bf16.msra.mxu1 %v3498_v57 }
 0x523   :  { %v3411_v0 = vpop.f32.mrb[25].mxu1  ;;  %v3418_v4 = vpop.f32.mrb[31].mxu0  ;;  %v1925_v6 = vcombine.high %v1901_v18, %v3605_v1  ;;  %v1926_v41 = vcombine.high %v1908_v16, %v3605_v1  ;;  %v1927_v31 = vcombine.high %v1917_v3, %v3605_v1  ;;  %v1928_v32 = vcombine.high %v1924_v19, %v3605_v1  ;;  %3433 = vmatprep.subr.bf16.mxu1 %v3605_v1 }
 0x524   :  { %v1720_v7 = vpop.f32.mrb[26].mxu1 }
 0x525   :  { %v3412_v10 = vpop.f32.mrb[27].mxu1  ;;  %v1997_v43 = vcombine.low %v1901_v18, %v1925_v6  ;;  %v2013_v21 = vcombine.low %v1908_v16, %v1926_v41  ;;  %v2065_v29 = vcombine.low %v1917_v3, %v1927_v31  ;;  %v2081_v44 = vcombine.low %v1924_v19, %v1928_v32 }
 0x527   :  { %v2004_v53 = vrot.slane %v1997_v43, %v3723_v8  ;;  %v2020_v54 = vrot.slane %v2013_v21, %v3723_v8  ;;  %v2072_v55 = vrot.slane %v2065_v29, %v3723_v8  ;;  %v2088_v56 = vrot.slane %v2081_v44, %v3723_v8 }
 0x528   :  { %v1855_v12 = vpop.f32.mrb[32].mxu0 }
 0x529   :  { %v1945_v14 = vcombine.low %v1763_v62, %v1855_v12  ;;  %v1946_v15 = vcombine.high %v1763_v62, %v1855_v12  ;;  %v3429_v17 = vpop.f32.mrb[33].mxu0 }
 0x52a   :  { %v1809_v46 = vpop.f32.mrb[28].mxu1  ;;  %v1858_v40 = vpop.f32.mrb[34].mxu0 }
 0x52b   :  { %v1929_v2 = vcombine.low %v1717_v63, %v1809_v46  ;;  %v1930_v22 = vcombine.high %v1717_v63, %v1809_v46  ;;  %v3423_v23 = vpop.f32.mrb[29].mxu1  ;;  %v3430_v24 = vpop.f32.mrb[35].mxu0  ;;  %v1953_v48 = vrot.slane %v1945_v14, %v3723_v8  ;;  %v1960_v9 = vrot.slane %v1946_v15, %v3723_v8  ;;  %v3499_v14 = vld [vmem:[%s4321_s3 + $0x8] sm:$0xff]   ;;  %s3614_s3 = smov 16  }
 0x52c   :  { %v1812_v25 = vpop.f32.mrb[30].mxu1  ;;  %3434 = vmatpush3.bf16.msra.mxu1 %v3499_v14 }
 0x52d   :  { %v1937_v26 = vrot.slane %v1929_v2, %v3723_v8  ;;  %v1944_v27 = vrot.slane %v1930_v22, %v3723_v8  ;;  %v3424_v30 = vpop.f32.mrb[31].mxu1  ;;  %3447 = vmatprep.subr.bf16.mxu1 %v3605_v1 }
 0x52f   :  { %v1961_v13 = vcombine.low %v1937_v26, %v1953_v48  ;;  %v1962_v33 = vcombine.high %v1937_v26, %v1953_v48  ;;  %v1977_v34 = vcombine.low %v1944_v27, %v1960_v9  ;;  %v1978_v20 = vcombine.high %v1944_v27, %v1960_v9 }
 0x531   :  { %v1969_v28 = vrot.slane %v1961_v13, %v3795_v60  ;;  %v1976_v11 = vrot.slane %v1962_v33, %v3795_v60  ;;  %v1985_v39 = vrot.slane %v1977_v34, %v3795_v60  ;;  %v1992_v42 = vrot.slane %v1978_v20, %v3795_v60 }
 0x533   :  { %v1993_v45 = vcombine.high %v1969_v28, %v3605_v1  ;;  %v1994_v47 = vcombine.high %v1976_v11, %v3605_v1  ;;  %v1995_v36 = vcombine.high %v1985_v39, %v3605_v1  ;;  %v1996_v35 = vcombine.high %v1992_v42, %v3605_v1 }
 0x535   :  { %v2005_v49 = vcombine.low %v1969_v28, %v1993_v45  ;;  %v2021_v50 = vcombine.low %v1976_v11, %v1994_v47  ;;  %v2073_v51 = vcombine.low %v1985_v39, %v1995_v36  ;;  %v2089_v52 = vcombine.low %v1992_v42, %v1996_v35  ;;  %v3263_v45 = vld [vmem:[%s4322_s4] ss:$0 sm:$0xff] }
 0x537   :  { %v2012_v58 = vrot.slane %v2005_v49, %v3723_v8  ;;  %v2028_v59 = vrot.slane %v2021_v50, %v3723_v8  ;;  %v2080_v61 = vrot.slane %v2073_v51, %v3723_v8  ;;  %v2096_v62 = vrot.slane %v2089_v52, %v3723_v8 }
 0x539   :  { %v2030_v38 = vcombine.high %v2004_v53, %v2012_v58  ;;  %v2046_v63 = vcombine.high %v2020_v54, %v2028_v59  ;;  %v2098_v37 = vcombine.high %v2072_v55, %v2080_v61  ;;  %v2114_v0 = vcombine.high %v2088_v56, %v2096_v62 }
 0x53a   :  { %v2029_v4 = vcombine.low %v2004_v53, %v2012_v58  ;;  %v2045_v7 = vcombine.low %v2020_v54, %v2028_v59  ;;  %v2097_v10 = vcombine.low %v2072_v55, %v2080_v61  ;;  %v2113_v12 = vcombine.low %v2088_v56, %v2096_v62  ;;  %v3546_v59 = vld [vmem:[%s4318_s0] sm:$0x3]  ;;  %v3547_v62 = vld [vmem:[%s4318_s0 + $0x2] sm:$0x3] }
 0x53b   :  { %v2044_v15 = vrot.slane %v2030_v38, %v3795_v60  ;;  %v2060_v17 = vrot.slane %v2046_v63, %v3795_v60  ;;  %v2112_v18 = vrot.slane %v2098_v37, %v3795_v60  ;;  %v2128_v16 = vrot.slane %v2114_v0, %v3795_v60  ;;  %v3548_v0 = vld [vmem:[%s4318_s0 + $0x4] sm:$0x3] }
 0x53c   :  { %v2037_v3 = vrot.slane %v2029_v4, %v3795_v60  ;;  %v2053_v19 = vrot.slane %v2045_v7, %v3795_v60  ;;  %v2105_v46 = vrot.slane %v2097_v10, %v3795_v60  ;;  %v2121_v40 = vrot.slane %v2113_v12, %v3795_v60  ;;  %v3549_v10 = vld [vmem:[%s4318_s0 + $0x6] sm:$0x3] }
 0x53d   :  { %v2063_v2 = vcombine.low %v2044_v15, %v2060_v17  ;;  %v2131_v22 = vcombine.low %v2112_v18, %v2128_v16  ;;  %v2064_v23 = vcombine.high %v2044_v15, %v2060_v17  ;;  %v2132_v24 = vcombine.high %v2112_v18, %v2128_v16  ;;  %v3550_v15 = vld [vmem:[%s4318_s0 + $0x8] sm:$0x3]  ;;  %v3551_v18 = vld [vmem:[%s4318_s0 + $0xa] sm:$0x3] }
 0x53e   :  { %v2062_v25 = vcombine.high %v2037_v3, %v2053_v19  ;;  %v2129_v48 = vcombine.low %v2105_v46, %v2121_v40  ;;  %v2130_v9 = vcombine.high %v2105_v46, %v2121_v40  ;;  %v2061_v26 = vcombine.low %v2037_v3, %v2053_v19  ;;  %v3552_v3 = vld [vmem:[%s4318_s0 + $0xc] sm:$0x3]  ;;  %v3553_v40 = vld [vmem:[%s4318_s0 + $0xe] sm:$0x3] }
 0x53f   :  { %v3486_v27 = vpack.i.bf16 %v2131_v22, %v2063_v2  ;;  %v3491_v30 = vpack.i.bf16 %v2132_v24, %v2064_v23 }
 0x540   :  { %v3481_v6 = vpack.i.bf16 %v2130_v9, %v2062_v25 }
 0x541   :  { %3487 = vrot.lane.b32.xlu1 %v3486_v27, %s3614_s3 }
 0x542   :  { %3482 = vrot.lane.b32.xlu0 %v3481_v6, %s3615_s14 }
 0x545   :  { %3492 = vrot.lane.b32.xlu1 %v3491_v30, %s3616_s1 }
 0x5b3   :  { %v3488_v60 = vpop.permute.xlu1 %3487 }
 0x5b4   :  { %v3483_v41 = vpop.permute.xlu0 %3482  ;;  %v3490_v31 = vunpack.i.h.bf16 %v3488_v60  ;;  %v3489_v32 = vunpack.i.l.bf16 %v3488_v60  ;;  %v3617_v60 = vmov 269488144  }
 0x5b5   :  { %v3485_v13 = vunpack.i.h.bf16 %v3483_v41  ;;  %v3484_v33 = vunpack.i.l.bf16 %v3483_v41  ;;  %v2343_v41 = vunpack.c.l.s4 %v3617_v60 }
 0x5b7   :  { %v2158_v34 = vsel %vm1027_vm2, %v2129_v48, %v3485_v13  ;;  %v2157_v20 = vsel %vm1027_vm2, %v2061_v26, %v3484_v33  ;;  %v3493_v28 = vpop.permute.xlu1 %3492  ;;  %v3619_v13 = vmov 1414812756  }
 0x5b8   :  { %v3495_v11 = vunpack.i.h.bf16 %v3493_v28  ;;  %v3494_v39 = vunpack.i.l.bf16 %v3493_v28  ;;  %v2160_v42 = vsel %vm2159_vm4, %v2157_v20, %v3489_v32  ;;  %v2161_v43 = vsel %vm2159_vm4, %v2158_v34, %v3490_v31 }
 0x5b9   :  { %v3618_v31 = vmov 842150450   ;;  %v2357_v33 = vunpack.c.l.s4 %v3619_v13  ;;  %v3620_v34 = vmov 1987475062   ;;  %v2344_v28 = vunpack.c.0.s8 %v2343_v41 }
 0x5ba   :  { %v2163_v21 = vsel %vm2162_vm5, %v2160_v42, %v3494_v39  ;;  %v2164_v29 = vsel %vm2162_vm5, %v2161_v43, %v3495_v11  ;;  %v2350_v32 = vunpack.c.l.s4 %v3618_v31  ;;  %v2364_v20 = vunpack.c.l.s4 %v3620_v34 }
 0x5bb   :  { %v2165_v44 = vpack.c.bf16 %v2164_v29, %v2163_v21  ;;  %v2358_v39 = vunpack.c.0.s8 %v2357_v33  ;;  %v4146_v43 = vsub.s32 %v2344_v28, %v3714_v5  ;;  %v3268_v33 = vld [vmem:[%s4324_s6] ss:$0 sm:$0xff] }
 0x5bc   :  { %v2351_v11 = vunpack.c.0.s8 %v2350_v32  ;;  %v2365_v42 = vunpack.c.0.s8 %v2364_v20  ;;  %v3267_v32 = vld [vmem:[%s4323_s5] ss:$0 sm:$0xff]  ;;  %v2591_v20 = vcombine.high %v3268_v33, %v3268_v33 }
 0x5bd   :  { %3436 = vmatmul.mubr.msk.bf16.vlgmr.msra.gmra.mrb[32].mxu1 %vm136_vm1, %v2165_v44  ;;  %v4152_v29 = vsub.s32 %v2358_v39, %v3714_v5  ;;  %v2557_v34 = vcombine.high %v3267_v32, %v3267_v32  ;;  %v2564_v28 = vrot.slane %v3267_v32, %v3723_v8  ;;  %v3504_v32 = vld [vmem:[%s4327_s9 + $0x10] sm:$0xff]  }
 0x5be   :  { %3455 = vmatprep.mubr.msk.bf16.mxu1 %vm3606_vm0, %v3605_v1  ;;  %v4149_v21 = vsub.s32 %v2351_v11, %v3714_v5  ;;  %v4155_v44 = vsub.s32 %v2365_v42, %v3714_v5  ;;  %v2598_v42 = vrot.slane %v3268_v33, %v3723_v8  ;;  %v3269_v33 = vld [vmem:[%s4326_s8] ss:$0 sm:$0xff] }
 0x5bf   :  { %v2571_v11 = vrot.slane %v2557_v34, %v3723_v8 }
 0x690   :  { %v2226_v47 = vpop.f32.mrb[32].mxu1 }
 0x691   :  { %v2227_v36 = vadd.f32 %v3263_v45, %v2226_v47  ;;  %v3437_v35 = vpop.f32.mrb[33].mxu1 }
 0x692   :  { %v2229_v49 = vpop.f32.mrb[34].mxu1 }
 0x693   :  { %v2235_v50 = vcombine.high %v2227_v36, %v2227_v36  ;;  %v2242_v51 = vrot.slane %v2227_v36, %v3723_v8  ;;  %v2230_v52 = vadd.f32 %v3263_v45, %v2229_v49  ;;  %v3438_v53 = vpop.f32.mrb[35].mxu1 }
 0x695   :  { %v2249_v54 = vrot.slane %v2235_v50, %v3723_v8  ;;  %v2250_v55 = vcombine.high %v2242_v51, %v2242_v51  ;;  %v2252_v56 = vcombine.high %v2230_v52, %v2230_v52  ;;  %v2259_v57 = vrot.slane %v2230_v52, %v3723_v8 }
 0x696   :  { %v2277_v61 = vadd.f32 %v3546_v59, %v2242_v51 }
 0x697   :  { %v2251_v58 = vcombine.high %v2249_v54, %v2249_v54  ;;  %v2278_v38 = vadd.f32 %v3547_v62, %v2250_v55  ;;  %v2266_v63 = vrot.slane %v2252_v56, %v3723_v8  ;;  %v2267_v37 = vcombine.high %v2259_v57, %v2259_v57 }
 0x698   :  { %v2279_v4 = vadd.f32 %v3548_v0, %v2249_v54  ;;  %v2281_v17 = vadd.f32 %v3550_v15, %v2259_v57 }
 0x699   :  { %v2268_v7 = vcombine.high %v2266_v63, %v2266_v63  ;;  %v2280_v12 = vadd.f32 %v3549_v10, %v2251_v58  ;;  %v2295_v14 = vcombine.low %v2277_v61, %v2278_v38  ;;  %v2282_v16 = vadd.f32 %v3551_v18, %v2267_v37 }
 0x69a   :  { %v2283_v19 = vadd.f32 %v3552_v3, %v2266_v63 }
 0x69b   :  { %v2296_v46 = vcombine.low %v2279_v4, %v2280_v12  ;;  %v2284_v2 = vadd.f32 %v3553_v40, %v2268_v7  ;;  %v2312_v22 = vcombine.low %v2281_v17, %v2282_v16  ;;  %v2303_v23 = vrot.slane %v2295_v14, %v3723_v8 }
 0x69d   :  { %v2310_v24 = vrot.slane %v2296_v46, %v3723_v8  ;;  %v2313_v25 = vcombine.low %v2283_v19, %v2284_v2  ;;  %v2320_v9 = vrot.slane %v2312_v22, %v3723_v8 }
 0x69f   :  { %v2311_v48 = vcombine.low %v2303_v23, %v2310_v24  ;;  %v2327_v26 = vrot.slane %v2313_v25, %v3723_v8 }
 0x6a1   :  { %v2331_v27 = vsel %vm136_vm1, %v2311_v48, 0.0  ;;  %v2328_v30 = vcombine.low %v2320_v9, %v2327_v26  ;;  %v3500_v48 = vld [vmem:[#allocation2] sm:$0xff]   ;;  %v3501_v9 = vld [vmem:[#allocation2 + $0x8] sm:$0xff]  }
 0x6a2   :  { %2332 = vadd.xlane.f32.xlu0 %v2331_v27  ;;  %3440 = vmatpush3.bf16.msra.mxu0 %v3500_v48  ;;  %v3502_v26 = vld [vmem:[%s4327_s9] sm:$0xff]   ;;  %v3503_v27 = vld [vmem:[%s4327_s9 + $0x8] sm:$0xff]  }
 0x6a3   :  { %v2334_v6 = vsel %vm136_vm1, %v2328_v30, 0.0  ;;  %3441 = vmatprep.subr.bf16.mxu0 %v3605_v1  ;;  %3448 = vmatpush3.bf16.msra.mxu1 %v3502_v26 }
 0x6a4   :  { %2335 = vadd.xlane.f32.xlu1 %v2334_v6  ;;  %3449 = vmatprep.subr.bf16.mxu1 %v3605_v1 }
 0x6a6   :  { %3442 = vmatpush3.bf16.msra.mxu0 %v3501_v9 }
 0x6a7   :  { %3450 = vmatpush3.bf16.msra.mxu1 %v3503_v27 }
 0x6a8   :  { %3451 = vmatprep.subr.bf16.mxu1 %v3605_v1 }
 0x6ab   :  { %3452 = vmatpush3.bf16.msra.mxu1 %v3504_v32 }
 0x6ac   :  { %3453 = vmatprep.subr.bf16.mxu1 %v3605_v1  ;;  %v3273_v1 = vld [vmem:[%s4328_s10] ss:$0 sm:$0xff] }
 0x72f   :  { %v2333_v45 = vpop.xlane.xlu0 %2332 }
 0x730   :  { %v2338_v47 = vmul.f32 0.03125, %v2333_v45  ;;  %v2605_v45 = vrot.slane %v2591_v20, %v3723_v8 }
 0x731   :  { %v2336_v36 = vpop.xlane.xlu1 %2335 }
 0x732   :  { %v2348_v35 = vrot.slane %v2338_v47, %v4146_v43  ;;  %v2355_v49 = vrot.slane %v2338_v47, %v4149_v21  ;;  %v2362_v50 = vrot.slane %v2338_v47, %v4152_v29  ;;  %v2369_v51 = vrot.slane %v2338_v47, %v4155_v44 }
 0x733   :  { %v2339_v52 = vmul.f32 0.03125, %v2336_v36 }
 0x734   :  { %v4161_v53 = vsub.f32 %v2277_v61, %v2348_v35  ;;  %v4163_v54 = vsub.f32 %v2278_v38, %v2355_v49  ;;  %v4165_v55 = vsub.f32 %v2279_v4, %v2362_v50  ;;  %v4167_v5 = vsub.f32 %v2280_v12, %v2369_v51 }
 0x735   :  { %v2376_v56 = vrot.slane %v2339_v52, %v4146_v43  ;;  %v2383_v57 = vrot.slane %v2339_v52, %v4149_v21  ;;  %v2390_v58 = vrot.slane %v2339_v52, %v4152_v29  ;;  %v2397_v59 = vrot.slane %v2339_v52, %v4155_v44 }
 0x736   :  { %v2414_v62 = vmul.f32 %v4161_v53, %v4161_v53  ;;  %v2415_v61 = vmul.f32 %v4163_v54, %v4163_v54  ;;  %v2416_v38 = vmul.f32 %v4165_v55, %v4165_v55  ;;  %v2417_v63 = vmul.f32 %v4167_v5, %v4167_v5 }
 0x737   :  { %v4181_v37 = vsub.f32 %v2281_v17, %v2376_v56  ;;  %v4183_v0 = vsub.f32 %v2282_v16, %v2383_v57  ;;  %v4185_v4 = vsub.f32 %v2283_v19, %v2390_v58  ;;  %v4187_v7 = vsub.f32 %v2284_v2, %v2397_v59 }
 0x738   :  { %v2430_v10 = vcombine.low %v2414_v62, %v2415_v61  ;;  %v2431_v12 = vcombine.low %v2416_v38, %v2417_v63  ;;  %v2572_v50 = vcombine.high %v2564_v28, %v2564_v28  ;;  %v2573_v51 = vcombine.high %v2571_v11, %v2571_v11 }
 0x739   :  { %v2418_v14 = vmul.f32 %v4181_v37, %v4181_v37  ;;  %v2419_v15 = vmul.f32 %v4183_v0, %v4183_v0  ;;  %v2420_v18 = vmul.f32 %v4185_v4, %v4185_v4  ;;  %v2421_v17 = vmul.f32 %v4187_v7, %v4187_v7 }
 0x73a   :  { %v2438_v16 = vrot.slane %v2430_v10, %v3723_v8  ;;  %v2445_v3 = vrot.slane %v2431_v12, %v3723_v8  ;;  %v2606_v62 = vcombine.high %v2598_v42, %v2598_v42  ;;  %v2607_v61 = vcombine.high %v2605_v45, %v2605_v45 }
 0x73b   :  { %v2447_v19 = vcombine.low %v2418_v14, %v2419_v15  ;;  %v2448_v46 = vcombine.low %v2420_v18, %v2421_v17 }
 0x73c   :  { %v2446_v40 = vcombine.low %v2438_v16, %v2445_v3 }
 0x73d   :  { %v2455_v2 = vrot.slane %v2447_v19, %v3723_v8  ;;  %v2462_v22 = vrot.slane %v2448_v46, %v3723_v8 }
 0x73e   :  { %v2466_v23 = vsel %vm136_vm1, %v2446_v40, 0.0 }
 0x73f   :  { %2467 = vadd.xlane.f32.xlu0 %v2466_v23  ;;  %v2463_v24 = vcombine.low %v2455_v2, %v2462_v22 }
 0x741   :  { %v2469_v25 = vsel %vm136_vm1, %v2463_v24, 0.0 }
 0x743   :  { %2470 = vadd.xlane.f32.xlu0 %v2469_v25 }
 0x7cc   :  { %v2468_v30 = vpop.xlane.xlu0 %2467 }
 0x7cd   :  { %v2472_v6 = vmul.f32 0.03125, %v2468_v30 }
 0x7cf   :  { %v2474_v60 = vadd.f32 1e-05, %v2472_v6 }
 0x7d0   :  { %v2471_v41 = vpop.xlane.xlu0 %2470 }
 0x7d1   :  { %3538 = vrsqrt.f32 %v2474_v60  ;;  %v2473_v31 = vmul.f32 0.03125, %v2471_v41 }
 0x7d3   :  { %v2475_v13 = vadd.f32 1e-05, %v2473_v31 }
 0x7d5   :  { %3540 = vrsqrt.f32 %v2475_v13  ;;  %v3505_v13 = vld [vmem:[%s4327_s9 + $0x18] sm:$0xff]  }
 0x7d6   :  { %3454 = vmatpush3.bf16.msra.mxu1 %v3505_v13 }
 0x7db   :  { %v3539_v39 = vpop.eup %3538 }
 0x7dc   :  { %v2486_v47 = vrot.slane %v3539_v39, %v4146_v43  ;;  %v2493_v36 = vrot.slane %v3539_v39, %v4149_v21  ;;  %v2500_v35 = vrot.slane %v3539_v39, %v4152_v29  ;;  %v2507_v49 = vrot.slane %v3539_v39, %v4155_v44 }
 0x7de   :  { %v2544_v52 = vmul.f32 %v2486_v47, %v4161_v53  ;;  %v2545_v56 = vmul.f32 %v2493_v36, %v4163_v54  ;;  %v2546_v57 = vmul.f32 %v2500_v35, %v4165_v55  ;;  %v2547_v58 = vmul.f32 %v2507_v49, %v4167_v5 }
 0x7df   :  { %v3541_v59 = vpop.eup %3540 }
 0x7e0   :  { %v2514_v38 = vrot.slane %v3541_v59, %v4146_v43  ;;  %v2521_v63 = vrot.slane %v3541_v59, %v4149_v21  ;;  %v2528_v10 = vrot.slane %v3541_v59, %v4152_v29  ;;  %v2535_v12 = vrot.slane %v3541_v59, %v4155_v44 }
 0x7e1   :  { %v2578_v14 = vmul.f32 %v2564_v28, %v2544_v52  ;;  %v2579_v15 = vmul.f32 %v2572_v50, %v2545_v56  ;;  %v2580_v53 = vmul.f32 %v2571_v11, %v2546_v57  ;;  %v2581_v18 = vmul.f32 %v2573_v51, %v2547_v58 }
 0x7e2   :  { %v2548_v54 = vmul.f32 %v2514_v38, %v4181_v37  ;;  %v2549_v55 = vmul.f32 %v2521_v63, %v4183_v0  ;;  %v2550_v5 = vmul.f32 %v2528_v10, %v4185_v4  ;;  %v2551_v17 = vmul.f32 %v2535_v12, %v4187_v7 }
 0x7e3   :  { %v2612_v16 = vadd.f32 %v2598_v42, %v2578_v14  ;;  %v2613_v3 = vadd.f32 %v2606_v62, %v2579_v15  ;;  %v2614_v19 = vadd.f32 %v2605_v45, %v2580_v53  ;;  %v2615_v46 = vadd.f32 %v2607_v61, %v2581_v18 }
 0x7e4   :  { %v2582_v40 = vmul.f32 %v2564_v28, %v2548_v54  ;;  %v2583_v2 = vmul.f32 %v2572_v50, %v2549_v55  ;;  %v2584_v22 = vmul.f32 %v2571_v11, %v2550_v5  ;;  %v2585_v23 = vmul.f32 %v2573_v51, %v2551_v17 }
 0x7e5   :  { %v2628_v24 = vcombine.low %v2612_v16, %v2613_v3  ;;  %v2629_v25 = vcombine.low %v2614_v19, %v2615_v46 }
 0x7e6   :  { %v2616_v48 = vadd.f32 %v2598_v42, %v2582_v40  ;;  %v2617_v9 = vadd.f32 %v2606_v62, %v2583_v2  ;;  %v2618_v26 = vadd.f32 %v2605_v45, %v2584_v22  ;;  %v2619_v37 = vadd.f32 %v2607_v61, %v2585_v23 }
 0x7e7   :  { %v2636_v0 = vrot.slane %v2628_v24, %v3723_v8  ;;  %v2643_v4 = vrot.slane %v2629_v25, %v3723_v8 }
 0x7e8   :  { %v2645_v27 = vcombine.low %v2616_v48, %v2617_v9  ;;  %v2646_v7 = vcombine.low %v2618_v26, %v2619_v37 }
 0x7e9   :  { %v2644_v60 = vcombine.low %v2636_v0, %v2643_v4 }
 0x7ea   :  { %v2653_v30 = vrot.slane %v2645_v27, %v3723_v8  ;;  %v2660_v6 = vrot.slane %v2646_v7, %v3723_v8 }
 0x7ec   :  { %v2661_v41 = vcombine.low %v2653_v30, %v2660_v6 }
 0x7ee   :  { %v2664_v31 = vpack.c.bf16 %v2661_v41, %v2644_v60 }
 0x7f0   :  { %3444 = vmatmul.mubr.msk.bf16.vlgmr.msra.gmra.mrb[36].mxu0 %vm136_vm1, %v2664_v31 }
 0x8c3   :  { %v2725_v34 = vpop.f32.mrb[36].mxu0 }
 0x8c4   :  { %v2726_v20 = vadd.f32 %v3269_v33, %v2725_v34  ;;  %v3445_v28 = vpop.f32.mrb[37].mxu0 }
 0x8c5   :  { %v2728_v11 = vpop.f32.mrb[38].mxu0 }
 0x8c6   :  { %v2729_v39 = vadd.f32 %v3269_v33, %v2728_v11  ;;  %v3446_v42 = vpop.f32.mrb[39].mxu0  ;;  %v2732_v45 = vmax.f32 %v2726_v20, 0.0 }
 0x8c8   :  { %v2733_v47 = vmax.f32 %v2729_v39, 0.0 }
 0x8ca   :  { %v2734_v36 = vpack.c.bf16 %v2733_v47, %v2732_v45 }
 0x8cc   :  { %3456 = vmatmul.mubr.msk.bf16.vlgmr.msra.gmra.mrb[36].mxu1 %vm2774_vm6, %v2734_v36 }
 0x99f   :  { %v2812_v35 = vpop.f32.mrb[36].mxu1 }
 0x9a0   :  { %v2813_v49 = vadd.f32 %v3273_v1, %v2812_v35  ;;  %v3457_v50 = vpop.f32.mrb[37].mxu1 }
 0x9a1   :  { %v2815_v51 = vpop.f32.mrb[38].mxu1 }
 0x9a2   :  { %v2821_v52 = vcombine.high %v2813_v49, %v2813_v49  ;;  %v2828_v56 = vrot.slane %v2813_v49, %v3723_v8  ;;  %v2816_v57 = vadd.f32 %v3273_v1, %v2815_v51  ;;  %v3458_v58 = vpop.f32.mrb[39].mxu1 }
 0x9a4   :  { %v2835_v59 = vrot.slane %v2821_v52, %v3723_v8  ;;  %v2836_v62 = vcombine.high %v2828_v56, %v2828_v56  ;;  %v2838_v61 = vcombine.high %v2816_v57, %v2816_v57  ;;  %v2845_v38 = vrot.slane %v2816_v57, %v3723_v8 }
 0x9a5   :  { %v2863_v10 = vadd.f32 %v2828_v56, %v2612_v16 }
 0x9a6   :  { %v2837_v63 = vcombine.high %v2835_v59, %v2835_v59  ;;  %v2864_v12 = vadd.f32 %v2836_v62, %v2613_v3  ;;  %v2852_v14 = vrot.slane %v2838_v61, %v3723_v8  ;;  %v2853_v15 = vcombine.high %v2845_v38, %v2845_v38 }
 0x9a7   :  { %v2865_v53 = vadd.f32 %v2835_v59, %v2614_v19  ;;  %v2867_v5 = vadd.f32 %v2845_v38, %v2616_v48 }
 0x9a8   :  { %v2854_v18 = vcombine.high %v2852_v14, %v2852_v14  ;;  %v2866_v54 = vadd.f32 %v2837_v63, %v2615_v46  ;;  %v2881_v55 = vcombine.low %v2863_v10, %v2864_v12  ;;  %v2868_v17 = vadd.f32 %v2853_v15, %v2617_v9 }
 0x9a9   :  { %v2869_v40 = vadd.f32 %v2852_v14, %v2618_v26 }
 0x9aa   :  { %v2882_v2 = vcombine.low %v2865_v53, %v2866_v54  ;;  %v2870_v22 = vadd.f32 %v2854_v18, %v2619_v37  ;;  %v2898_v23 = vcombine.low %v2867_v5, %v2868_v17  ;;  %v2889_v24 = vrot.slane %v2881_v55, %v3723_v8 }
 0x9ac   :  { %v2896_v25 = vrot.slane %v2882_v2, %v3723_v8  ;;  %v2899_v0 = vcombine.low %v2869_v40, %v2870_v22  ;;  %v2906_v3 = vrot.slane %v2898_v23, %v3723_v8  ;;  %v3280_v2 = vld [vmem:[%s4330_s12] ss:$0 sm:$0xff] }
 0x9ad   :  { %v3176_v23 = vcombine.high %v3280_v2, %v3280_v2 }
 0x9ae   :  { %v2897_v16 = vcombine.low %v2889_v24, %v2896_v25  ;;  %v2913_v4 = vrot.slane %v2899_v0, %v3723_v8  ;;  %v3183_v0 = vrot.slane %v3280_v2, %v3723_v8 }
 0x9b0   :  { %v2917_v19 = vsel %vm136_vm1, %v2897_v16, 0.0  ;;  %v2914_v46 = vcombine.low %v2906_v3, %v2913_v4  ;;  %v3190_v16 = vrot.slane %v3176_v23, %v3723_v8 }
 0x9b1   :  { %2918 = vadd.xlane.f32.xlu1 %v2917_v19 }
 0x9b2   :  { %v2920_v48 = vsel %vm136_vm1, %v2914_v46, 0.0 }
 0x9b3   :  { %2921 = vadd.xlane.f32.xlu0 %v2920_v48 }
 0xa3e   :  { %v2919_v9 = vpop.xlane.xlu1 %2918 }
 0xa3f   :  { %v2923_v26 = vmul.f32 0.03125, %v2919_v9 }
 0xa40   :  { %v2922_v37 = vpop.xlane.xlu0 %2921 }
 0xa41   :  { %v2933_v27 = vrot.slane %v2923_v26, %v4146_v43  ;;  %v2940_v7 = vrot.slane %v2923_v26, %v4149_v21  ;;  %v2947_v30 = vrot.slane %v2923_v26, %v4152_v29  ;;  %v2954_v6 = vrot.slane %v2923_v26, %v4155_v44 }
 0xa42   :  { %v2924_v60 = vmul.f32 0.03125, %v2922_v37  ;;  %v3191_v37 = vcombine.high %v3183_v0, %v3183_v0 }
 0xa43   :  { %v2991_v41 = vsub.f32 %v2863_v10, %v2933_v27  ;;  %v2992_v31 = vsub.f32 %v2864_v12, %v2940_v7  ;;  %v2993_v32 = vsub.f32 %v2865_v53, %v2947_v30  ;;  %v2994_v13 = vsub.f32 %v2866_v54, %v2954_v6 }
 0xa44   :  { %v2961_v33 = vrot.slane %v2924_v60, %v4146_v43  ;;  %v2968_v34 = vrot.slane %v2924_v60, %v4149_v21  ;;  %v2975_v20 = vrot.slane %v2924_v60, %v4152_v29  ;;  %v2982_v28 = vrot.slane %v2924_v60, %v4155_v44 }
 0xa45   :  { %v2999_v11 = vmul.f32 %v2991_v41, %v2991_v41  ;;  %v3000_v39 = vmul.f32 %v2992_v31, %v2992_v31  ;;  %v3001_v42 = vmul.f32 %v2993_v32, %v2993_v32  ;;  %v3002_v45 = vmul.f32 %v2994_v13, %v2994_v13 }
 0xa46   :  { %v2995_v47 = vsub.f32 %v2867_v5, %v2961_v33  ;;  %v2996_v36 = vsub.f32 %v2868_v17, %v2968_v34  ;;  %v2997_v1 = vsub.f32 %v2869_v40, %v2975_v20  ;;  %v2998_v35 = vsub.f32 %v2870_v22, %v2982_v28  ;;  %v3279_v17 = vld [vmem:[%s4329_s11] ss:$0 sm:$0xff]  ;;  %s3621_s11 = smov [#allocation5]  }
 0xa47   :  { %v3015_v49 = vcombine.low %v2999_v11, %v3000_v39  ;;  %v3016_v50 = vcombine.low %v3001_v42, %v3002_v45  ;;  %v3142_v22 = vcombine.high %v3279_v17, %v3279_v17  ;;  %v3149_v24 = vrot.slane %v3279_v17, %v3723_v8  ;;  %s3219_s12 = sshll.u32 %s3621_s11, 4  ;;  %s3220_s12 = int_to_ptr.vmem [resolvable:$true] %s3219_s12 }
 0xa48   :  { %v3003_v51 = vmul.f32 %v2995_v47, %v2995_v47  ;;  %v3004_v52 = vmul.f32 %v2996_v36, %v2996_v36  ;;  %v3005_v56 = vmul.f32 %v2997_v1, %v2997_v1  ;;  %v3006_v57 = vmul.f32 %v2998_v35, %v2998_v35  ;;  %s3576_s24 = scalar_lea.vmem %s3220_s12, 256  ;;  %p3581_p9 = scmp.lt.s32.totalorder %s3220_s12, %s3220_s12 }
 0xa49   :  { %v3023_v58 = vrot.slane %v3015_v49, %v3723_v8  ;;  %v3030_v59 = vrot.slane %v3016_v50, %v3723_v8  ;;  %v3156_v25 = vrot.slane %v3142_v22, %v3723_v8  ;;  %v3157_v4 = vcombine.high %v3149_v24, %v3149_v24  ;;  %p3577_p8 = scmp.ne.s32.totalorder %s3220_s12, %s3576_s24  ;;  %p3582_p10 = scmp.lt.s32.totalorder %s3576_s24, %s3576_s24 }
 0xa4a   :  { %v3032_v62 = vcombine.low %v3003_v51, %v3004_v52  ;;  %v3033_v61 = vcombine.low %v3005_v56, %v3006_v57  ;;  %v3192_v27 = vcombine.high %v3190_v16, %v3190_v16 }
 0xa4b   :  { %v3031_v38 = vcombine.low %v3023_v58, %v3030_v59  ;;  %v3158_v19 = vcombine.high %v3156_v25, %v3156_v25  ;;  %p3583_p11 = por %p3582_p10, %p3581_p9 }
 0xa4c   :  { %v3040_v63 = vrot.slane %v3032_v62, %v3723_v8  ;;  %v3047_v10 = vrot.slane %v3033_v61, %v3723_v8 }
 0xa4d   :  { %v3051_v12 = vsel %vm136_vm1, %v3031_v38, 0.0  ;;  %p3584_p12 = pnand %p3583_p11, %p3577_p8 }
 0xa4e   :  { %3052 = vadd.xlane.f32.xlu1 %v3051_v12  ;;  %v3048_v14 = vcombine.low %v3040_v63, %v3047_v10 }
 0xa50   :  { %v3054_v15 = vsel %vm136_vm1, %v3048_v14, 0.0 }
 0xa51   :  { %3055 = vadd.xlane.f32.xlu0 %v3054_v15 }
 0xadb   :  { %v3053_v53 = vpop.xlane.xlu1 %3052 }
 0xadc   :  { %v3057_v18 = vmul.f32 0.03125, %v3053_v53 }
 0xade   :  { %v3059_v54 = vadd.f32 1e-05, %v3057_v18  ;;  %v3056_v55 = vpop.xlane.xlu0 %3055 }
 0xadf   :  { %v3058_v5 = vmul.f32 0.03125, %v3056_v55 }
 0xae0   :  { %3542 = vrsqrt.f32 %v3059_v54 }
 0xae1   :  { %v3060_v40 = vadd.f32 1e-05, %v3058_v5 }
 0xae3   :  { %3544 = vrsqrt.f32 %v3060_v40 }
 0xaea   :  { %v3543_v3 = vpop.eup %3542 }
 0xaeb   :  { %v3071_v46 = vrot.slane %v3543_v3, %v4146_v43  ;;  %v3078_v48 = vrot.slane %v3543_v3, %v4149_v21  ;;  %v3085_v9 = vrot.slane %v3543_v3, %v4152_v29  ;;  %v3092_v26 = vrot.slane %v3543_v3, %v4155_v44 }
 0xaed   :  { %v3545_v7 = vpop.eup %3544  ;;  %v3129_v30 = vmul.f32 %v3071_v46, %v2991_v41  ;;  %v3130_v6 = vmul.f32 %v3078_v48, %v2992_v31  ;;  %v3131_v60 = vmul.f32 %v3085_v9, %v2993_v32  ;;  %v3132_v33 = vmul.f32 %v3092_v26, %v2994_v13 }
 0xaee   :  { %v3099_v8 = vrot.slane %v3545_v7, %v4146_v43  ;;  %v3106_v34 = vrot.slane %v3545_v7, %v4149_v21  ;;  %v3113_v20 = vrot.slane %v3545_v7, %v4152_v29  ;;  %v3120_v28 = vrot.slane %v3545_v7, %v4155_v44 }
 0xaef   :  { %v3163_v11 = vmul.f32 %v3149_v24, %v3129_v30  ;;  %v3164_v39 = vmul.f32 %v3157_v4, %v3130_v6  ;;  %v3165_v42 = vmul.f32 %v3156_v25, %v3131_v60  ;;  %v3166_v45 = vmul.f32 %v3158_v19, %v3132_v33 }
 0xaf0   :  { %v3133_v49 = vmul.f32 %v3099_v8, %v2995_v47  ;;  %v3134_v50 = vmul.f32 %v3106_v34, %v2996_v36  ;;  %v3135_v51 = vmul.f32 %v3113_v20, %v2997_v1  ;;  %v3136_v52 = vmul.f32 %v3120_v28, %v2998_v35 }
 0xaf1   :  { %v3197_v41 = vadd.f32 %v3183_v0, %v3163_v11  ;;  %v3198_v31 = vadd.f32 %v3191_v37, %v3164_v39  ;;  %v3199_v32 = vadd.f32 %v3190_v16, %v3165_v42  ;;  %v3200_v13 = vadd.f32 %v3192_v27, %v3166_v45 }
 0xaf2   :  { %v3167_v43 = vmul.f32 %v3149_v24, %v3133_v49  ;;  %v3168_v21 = vmul.f32 %v3157_v4, %v3134_v50  ;;  %v3169_v56 = vmul.f32 %v3156_v25, %v3135_v51  ;;  %v3170_v29 = vmul.f32 %v3158_v19, %v3136_v52 }
 0xaf3   :  { %3206 = vst.msk [vmem:[#allocation5] sm:$0x3] %vm3205_vm7, %v3197_v41  ;;  %3207 = vst.msk [vmem:[#allocation5 + $0x2] sm:$0x3] %vm3205_vm7, %v3198_v31 }
 0xaf4   :  { %3208 = vst.msk [vmem:[#allocation5 + $0x4] sm:$0x3] %vm3205_vm7, %v3199_v32  ;;  %3209 = vst.msk [vmem:[#allocation5 + $0x6] sm:$0x3] %vm3205_vm7, %v3200_v13  ;;  %v3201_v44 = vadd.f32 %v3183_v0, %v3167_v43  ;;  %v3202_v47 = vadd.f32 %v3191_v37, %v3168_v21  ;;  %v3203_v36 = vadd.f32 %v3190_v16, %v3169_v56 }
 0xaf5   :  { %v3204_v1 = vadd.f32 %v3192_v27, %v3170_v29 }
 0xaf6   :  { %3210 = vst.msk [vmem:[#allocation5 + $0x8] sm:$0x3] %vm3205_vm7, %v3201_v44  ;;  %3211 = vst.msk [vmem:[#allocation5 + $0xa] sm:$0x3] %vm3205_vm7, %v3202_v47 }
 0xaf7   :  { %3212 = vst.msk [vmem:[#allocation5 + $0xc] sm:$0x3] %vm3205_vm7, %v3203_v36  ;;  %3213 = vst.msk [vmem:[#allocation5 + $0xe] sm:$0x3] %vm3205_vm7, %v3204_v1 }
 0xaf8   :  { %3587 = shalt.err (!%p3584_p12)
}
 0xaf9   :  { %s3588_s27 = scalar_lea.hbm %s4331_s13, 256 }
 0xafa   :  { %p3589_p13 = scmp.ne.s32.totalorder %s4331_s13, %s3588_s27  ;;  %p3592_p0 = scmp.lt.u32.totalorder %s3588_s27, %s4331_s13 }
 0xafc   :  { %p3594_p1 = pnand %p3592_p0, %p3589_p13 }
 0xafe   :  { %3597 = shalt.err (!%p3594_p1)
}
 0xaff   :  { %s3622_s0 = smov 32   ;;  %s3623_s30 = smov 2  }
 0xb00   :  { %3225 = dma.vmem_to_hbm [thread:$0]  %s3220_s12, 256, %s4331_s13, [#allocation4], %s3622_s0, %s3622_s0, %s3623_s30  }
 0xb01   :  { %3600 = dma.done.wait [#allocation4], 256  }
 0xb02   :  { %3601 = vsyncadd [#allocation4], 4294967040 }
 0xb03   :  { %3229 = vsyncpa [#allocation3], 1 }
 0xb04   :  { %3230 = vsyncpa [#allocation4], 1 }

</bundles_post_ra>
